<compile_context>
chip_gen: v7x
topology: tpu7x:2x2x1
jax: 0.10.0
libtpu: 0.0.40
codegen_flags: <defaults>
</compile_context>

<pallas_src>
import functools
import math

import jax
import jax.numpy as jnp
from jax.experimental import pallas as pl
from jax.experimental.pallas import tpu as pltpu


# ----------------------------------------------------------------------------
# Fused Pallas kernel
# ----------------------------------------------------------------------------
def _birnn_fused_kernel(*refs, num_layers, hidden_size, seq_len, batch_padded):
    """Fused bidirectional LSTM stack + Linear head.

    refs layout (inputs, then outputs, then scratch):
      [0]             x_flat (T*Bp, D_in)   time-major rows: row = t*Bp + b
      [1 .. 1+4L)     per layer: wihf_zip (D,8H), wihb_zip (D,8H),
                                 whh_zip (2H,8H), b_zip (1,8H)
      [1+4L], [2+4L]  fc_w_row (1, 2H), fc_b (1, 1)
      [3+4L]          out (Bp, 1)
      [4+4L ..]       VMEM scratch (T*Bp, 2H) (layer-output buffers; none
                      needed for the last layer)

    Zipped gate column layout (8H wide): [i_f i_b | f_f f_b | g_f g_b | o_f o_b].
    Hidden/cell state layout (2H wide):  [h_f | h_b].
    """
    H, T, Bp = hidden_size, seq_len, batch_padded
    n_w = 4 * num_layers
    x_ref = refs[0]
    w_refs = refs[1:1 + n_w]
    fc_w_ref = refs[1 + n_w]
    fc_b_ref = refs[2 + n_w]
    out_ref = refs[3 + n_w]
    scr_refs = refs[4 + n_w:]
    n_scr = max(1, len(scr_refs))

    hf_last = None
    hb_last = None

    for l in range(num_layers):
        is_last = (l == num_layers - 1)
        wihf, wihb, whh, b = w_refs[4 * l:4 * l + 4]

        # Layer input: resident x for layer 0, previous layer's scratch after.
        inp = x_ref[...] if l == 0 else scr_refs[(l - 1) % n_scr][...]

        # Input projection for ALL timesteps, hoisted off the recurrence.
        # gxa carries the fwd W_ih projection + full zipped bias (bwd columns
        # of wihf_zip are zero); gxb carries the bwd W_ih projection.
        if inp.shape[1] == 1:
            # K=1 matmul is a degenerate outer product -> VPU broadcast mul.
            gxa = inp * wihf[...] + b[...]                       # (T*Bp, 8H)
            gxb = inp * wihb[...]
        else:
            gxa = jnp.dot(inp, wihf[...],
                          preferred_element_type=jnp.float32) + b[...]
            gxb = jnp.dot(inp, wihb[...],
                          preferred_element_type=jnp.float32)

        whh_v = whh[...]                                         # (2H, 8H)
        h = jnp.zeros((Bp, 2 * H), jnp.float32)                  # [h_f | h_b]
        c = jnp.zeros((Bp, 2 * H), jnp.float32)
        out_buf = None if is_last else scr_refs[l % n_scr]

        # T is small & static -> unrolled loop (full scheduler visibility).
        # TODO(synk): switch to lax.fori_loop(..., unroll=k) over a gate
        # scratch for long T.
        for s in range(T):
            rs = T - 1 - s
            # fwd half sees timestep s, bwd half sees timestep rs.
            gx = gxa[s * Bp:(s + 1) * Bp, :] + gxb[rs * Bp:(rs + 1) * Bp, :]
            gates = gx + jnp.dot(h, whh_v,
                                 preferred_element_type=jnp.float32)  # (Bp,8H)
            sig = jax.nn.sigmoid(gates)            # one full-width EUP pass
            g_act = jnp.tanh(gates[:, 4 * H:6 * H])
            i_act = sig[:, 0:2 * H]
            f_act = sig[:, 2 * H:4 * H]
            o_act = sig[:, 6 * H:8 * H]
            c = f_act * c + i_act * g_act
            h = o_act * jnp.tanh(c)

            if not is_last:
                # Write directly into the concatenated [fwd | bwd] layout.
                out_buf[s * Bp:(s + 1) * Bp, 0:H] = h[:, 0:H]         # t = s
                out_buf[rs * Bp:(rs + 1) * Bp, H:2 * H] = h[:, H:2 * H]  # t = rs
            elif s == 0:
                # Backward hidden at t = T-1 is produced on the FIRST zipped
                # step; the remaining bwd work rides along for free.
                hb_last = h[:, H:2 * H]

        if is_last:
            hf_last = h[:, 0:H]

    # FC head on out[:, -1, :] == [h_f(T-1) | h_b(T-1)].
    last = jnp.concatenate([hf_last, hb_last], axis=-1)          # (Bp, 2H)
    out_ref[...] = (jnp.sum(last * fc_w_ref[...], axis=-1, keepdims=True)
                    + fc_b_ref[...])


# ----------------------------------------------------------------------------
# Wrapper
# ----------------------------------------------------------------------------
def birnn_forward(x, params, hidden_size, num_layers):
    """x: (B, T, input_size) batch-first, like the PyTorch module."""
    B, T, Din = x.shape
    H = hidden_size
    Bp = ((B + 7) // 8) * 8            # pad batch to a full sublane group
    # Time-major, batch-padded, flat: row = t*Bp + b (tile-aligned per step).
    x_tm = jnp.transpose(x, (1, 0, 2)).astype(jnp.float32)       # (T, B, Din)
    x_tm = jnp.pad(x_tm, ((0, 0), (0, Bp - B), (0, 0)))
    x_flat = x_tm.reshape(T * Bp, Din)

    inputs = [x_flat]
    for l in range(num_layers):
        p = params["lstm"][l]
        inputs += [p["wihf_zip"], p["wihb_zip"], p["whh_zip"], p["b_zip"]]
    inputs += [params["fc_w_row"], params["fc_b"]]

    n_scr = 1 if num_layers <= 2 else 2   # last layer never stores its output

    kernel = functools.partial(
        _birnn_fused_kernel,
        num_layers=num_layers, hidden_size=H, seq_len=T, batch_padded=Bp)

    out = pl.pallas_call(
        kernel,
        out_shape=jax.ShapeDtypeStruct((Bp, 1), jnp.float32),
        grid=(1,),
        in_specs=[
            pl.BlockSpec(a.shape, lambda i, _n=a.ndim: (0,) * _n) for a in inputs
        ],
        out_specs=pl.BlockSpec((Bp, 1), lambda i: (0, 0)),
        scratch_shapes=[
            pltpu.VMEM((T * Bp, 2 * H), jnp.float32) for _ in range(n_scr)
        ],
        compiler_params=pltpu.CompilerParams(
            dimension_semantics=("arbitrary",)),
    )(*inputs)
    return out[:B]


# ----------------------------------------------------------------------------
# Parameter init (PyTorch-style uniform(-1/sqrt(H), 1/sqrt(H))) + zipped repack
# ----------------------------------------------------------------------------
def _zip_gate_cols(fwd_blocks, bwd_blocks):
    """Interleave per-gate column blocks: [i_f i_b | f_f f_b | g_f g_b | o_f o_b]."""
    cols = []
    for g in range(4):
        cols.append(fwd_blocks[g])
        cols.append(bwd_blocks[g])
    return jnp.concatenate(cols, axis=-1)


def _build_zipped_layer(raw, H, d_in):
    w_ih_f, w_hh_f, b_ih_f, b_hh_f = raw["fwd"]
    w_ih_b, w_hh_b, b_ih_b, b_hh_b = raw["bwd"]
    wihf_t, wihb_t = w_ih_f.T, w_ih_b.T          # (d_in, 4H)
    whhf_t, whhb_t = w_hh_f.T, w_hh_b.T          # (H, 4H)
    zD = jnp.zeros((d_in, H), jnp.float32)
    zH = jnp.zeros((H, H), jnp.float32)

    wihf_zip = _zip_gate_cols(
        [wihf_t[:, g * H:(g + 1) * H] for g in range(4)], [zD] * 4)
    wihb_zip = _zip_gate_cols(
        [zD] * 4, [wihb_t[:, g * H:(g + 1) * H] for g in range(4)])
    whh_top = _zip_gate_cols(
        [whhf_t[:, g * H:(g + 1) * H] for g in range(4)], [zH] * 4)
    whh_bot = _zip_gate_cols(
        [zH] * 4, [whhb_t[:, g * H:(g + 1) * H] for g in range(4)])
    whh_zip = jnp.concatenate([whh_top, whh_bot], axis=0)        # (2H, 8H)

    bf = b_ih_f + b_hh_f
    bb = b_ih_b + b_hh_b
    b_zip = _zip_gate_cols(
        [bf[None, g * H:(g + 1) * H] for g in range(4)],
        [bb[None, g * H:(g + 1) * H] for g in range(4)])         # (1, 8H)

    return {"wihf_zip": wihf_zip, "wihb_zip": wihb_zip,
            "whh_zip": whh_zip, "b_zip": b_zip}


def init_params(key, input_size, hidden_size, num_layers):
    H = hidden_size
    k = 1.0 / math.sqrt(H)
    params = {"lstm": []}
    for l in range(num_layers):
        d_in = input_size if l == 0 else 2 * H
        raw = {}
        for d in ("fwd", "bwd"):
            key, k1, k2, k3, k4 = jax.random.split(key, 5)
            w_ih = jax.random.uniform(k1, (4 * H, d_in), jnp.float32, -k, k)
            w_hh = jax.random.uniform(k2, (4 * H, H), jnp.float32, -k, k)
            b_ih = jax.random.uniform(k3, (4 * H,), jnp.float32, -k, k)
            b_hh = jax.random.uniform(k4, (4 * H,), jnp.float32, -k, k)
            raw[d] = (w_ih, w_hh, b_ih, b_hh)
        layer = _build_zipped_layer(raw, H, d_in)
        layer["_raw"] = raw                       # kept for the JAX reference
        params["lstm"].append(layer)

    key, kf1, kf2 = jax.random.split(key, 3)
    kfc = 1.0 / math.sqrt(2 * H)
    fc_w = jax.random.uniform(kf1, (1, 2 * H), jnp.float32, -kfc, kfc)
    fc_b = jax.random.uniform(kf2, (1,), jnp.float32, -kfc, kfc)
    params["fc_w_row"] = fc_w                     # (1, 2H)
    params["fc_b"] = fc_b[None, :]                # (1, 1)
    return params


# ----------------------------------------------------------------------------
# Pure-JAX reference (for validation only)
# ----------------------------------------------------------------------------
def birnn_reference(x, params, hidden_size, num_layers):
    H = hidden_size
    B, T, _ = x.shape

    def run_dir(seq_tm, raw):  # seq_tm: (T, B, D_in)
        w_ih, w_hh, b_ih, b_hh = raw

        def step(carry, x_t):
            h, c = carry
            gates = x_t @ w_ih.T + b_ih + h @ w_hh.T + b_hh
            i = jax.nn.sigmoid(gates[:, :H])
            f = jax.nn.sigmoid(gates[:, H:2 * H])
            g = jnp.tanh(gates[:, 2 * H:3 * H])
            o = jax.nn.sigmoid(gates[:, 3 * H:])
            c = f * c + i * g
            h = o * jnp.tanh(c)
            return (h, c), h

        h0 = jnp.zeros((B, H), jnp.float32)
        c0 = jnp.zeros((B, H), jnp.float32)
        _, hs = jax.lax.scan(step, (h0, c0), seq_tm)
        return hs  # (T, B, H)

    layer_in = jnp.transpose(x, (1, 0, 2)).astype(jnp.float32)
    for l in range(num_layers):
        raw = params["lstm"][l]["_raw"]
        hf = run_dir(layer_in, raw["fwd"])
        hb = run_dir(layer_in[::-1], raw["bwd"])[::-1]
        layer_in = jnp.concatenate([hf, hb], axis=-1)
    last = layer_in[-1]
    return last @ params["fc_w_row"].T + params["fc_b"]


# ----------------------------------------------------------------------------
if __name__ == "__main__":
    INPUT_SIZE = 1
    HIDDEN_SIZE = 32
    NUM_LAYERS = 2
    BATCH = 2
    SEQ = 8

    key = jax.random.PRNGKey(0)
    key, kp, kx = jax.random.split(key, 3)
    params = init_params(kp, INPUT_SIZE, HIDDEN_SIZE, NUM_LAYERS)
    x = jax.random.normal(kx, (BATCH, SEQ, INPUT_SIZE), jnp.float32)

    out = birnn_forward(x, params, HIDDEN_SIZE, NUM_LAYERS)
    out = jax.block_until_ready(out)

    ref = birnn_reference(x, params, HIDDEN_SIZE, NUM_LAYERS)
    assert out.shape == (BATCH, 1), out.shape
    assert jnp.allclose(out, ref, atol=1e-4, rtol=1e-4), (out, ref)

    print("KERNEL_OK")
</pallas_src>

<mosaic_0001>
module attributes {stable_mosaic.version = 11 : i64} {
  func.func @_birnn_fused_kernel(%arg0: i32, %arg1: memref<64x1xf32, #tpu.memory_space<vmem>>, %arg2: memref<1x256xf32, #tpu.memory_space<vmem>>, %arg3: memref<1x256xf32, #tpu.memory_space<vmem>>, %arg4: memref<64x256xf32, #tpu.memory_space<vmem>>, %arg5: memref<1x256xf32, #tpu.memory_space<vmem>>, %arg6: memref<64x256xf32, #tpu.memory_space<vmem>>, %arg7: memref<64x256xf32, #tpu.memory_space<vmem>>, %arg8: memref<64x256xf32, #tpu.memory_space<vmem>>, %arg9: memref<1x256xf32, #tpu.memory_space<vmem>>, %arg10: memref<1x64xf32, #tpu.memory_space<vmem>>, %arg11: memref<1x1xf32, #tpu.memory_space<vmem>>, %arg12: memref<8x1xf32, #tpu.memory_space<vmem>>, %arg13: memref<64x64xf32, #tpu.memory_space<vmem>>) attributes {dimension_semantics = [#tpu.dimension_semantics<arbitrary>], iteration_bounds = array<i64: 1>, scalar_prefetch = 0 : i64, scratch_operands = 1 : i64, tpu.core_type = #tpu.core_type<tc>, window_params = [{pipeline_mode = #tpu.pipeline_mode<synchronous>, transform_indices = @transform_0, window_bounds = array<i64: 64, 1>}, {pipeline_mode = #tpu.pipeline_mode<synchronous>, transform_indices = @transform_1, window_bounds = array<i64: 1, 256>}, {pipeline_mode = #tpu.pipeline_mode<synchronous>, transform_indices = @transform_2, window_bounds = array<i64: 1, 256>}, {pipeline_mode = #tpu.pipeline_mode<synchronous>, transform_indices = @transform_3, window_bounds = array<i64: 64, 256>}, {pipeline_mode = #tpu.pipeline_mode<synchronous>, transform_indices = @transform_4, window_bounds = array<i64: 1, 256>}, {pipeline_mode = #tpu.pipeline_mode<synchronous>, transform_indices = @transform_5, window_bounds = array<i64: 64, 256>}, {pipeline_mode = #tpu.pipeline_mode<synchronous>, transform_indices = @transform_6, window_bounds = array<i64: 64, 256>}, {pipeline_mode = #tpu.pipeline_mode<synchronous>, transform_indices = @transform_7, window_bounds = array<i64: 64, 256>}, {pipeline_mode = #tpu.pipeline_mode<synchronous>, transform_indices = @transform_8, window_bounds = array<i64: 1, 256>}, {pipeline_mode = #tpu.pipeline_mode<synchronous>, transform_indices = @transform_9, window_bounds = array<i64: 1, 64>}, {pipeline_mode = #tpu.pipeline_mode<synchronous>, transform_indices = @transform_10, window_bounds = array<i64: 1, 1>}, {pipeline_mode = #tpu.pipeline_mode<synchronous>, transform_indices = @transform_11, window_bounds = array<i64: 8, 1>}]} {
    %c0 = arith.constant 0 : index
    %c0_0 = arith.constant 0 : index
    %0 = vector.load %arg1[%c0, %c0_0] : memref<64x1xf32, #tpu.memory_space<vmem>>, vector<64x1xf32>
    %c0_1 = arith.constant 0 : index
    %c0_2 = arith.constant 0 : index
    %1 = vector.load %arg2[%c0_1, %c0_2] : memref<1x256xf32, #tpu.memory_space<vmem>>, vector<1x256xf32>
    %2 = vector.broadcast %0 : vector<64x1xf32> to vector<64x256xf32>
    %3 = vector.broadcast %1 : vector<1x256xf32> to vector<64x256xf32>
    %4 = arith.mulf %2, %3 : vector<64x256xf32>
    %c0_3 = arith.constant 0 : index
    %c0_4 = arith.constant 0 : index
    %5 = vector.load %arg5[%c0_3, %c0_4] : memref<1x256xf32, #tpu.memory_space<vmem>>, vector<1x256xf32>
    %6 = vector.broadcast %5 : vector<1x256xf32> to vector<64x256xf32>
    %7 = arith.addf %4, %6 : vector<64x256xf32>
    %c0_5 = arith.constant 0 : index
    %c0_6 = arith.constant 0 : index
    %8 = vector.load %arg3[%c0_5, %c0_6] : memref<1x256xf32, #tpu.memory_space<vmem>>, vector<1x256xf32>
    %9 = vector.broadcast %0 : vector<64x1xf32> to vector<64x256xf32>
    %10 = vector.broadcast %8 : vector<1x256xf32> to vector<64x256xf32>
    %11 = arith.mulf %9, %10 : vector<64x256xf32>
    %c0_7 = arith.constant 0 : index
    %c0_8 = arith.constant 0 : index
    %12 = vector.load %arg4[%c0_7, %c0_8] : memref<64x256xf32, #tpu.memory_space<vmem>>, vector<64x256xf32>
    %cst = arith.constant 0.000000e+00 : f32
    %13 = vector.broadcast %cst : f32 to vector<8x64xf32>
    %cst_9 = arith.constant 0.000000e+00 : f32
    %14 = vector.broadcast %cst_9 : f32 to vector<8x64xf32>
    %15 = vector.extract_strided_slice %7 {offsets = [0, 0], sizes = [8, 256], strides = [1, 1]} : vector<64x256xf32> to vector<8x256xf32>
    %16 = vector.extract_strided_slice %11 {offsets = [56, 0], sizes = [8, 256], strides = [1, 1]} : vector<64x256xf32> to vector<8x256xf32>
    %17 = arith.addf %15, %16 : vector<8x256xf32>
    %cst_10 = arith.constant dense<0.000000e+00> : vector<8x256xf32>
    %18 = tpu.matmul %13, %12, %cst_10 {dimension_numbers = #tpu.dot_dimension_numbers<[1], [0], [0], [1], [0, 0, 1, 1], [], []>} : vector<8x64xf32>, vector<64x256xf32>, vector<8x256xf32> -> vector<8x256xf32>
    %19 = arith.addf %17, %18 : vector<8x256xf32>
    %20 = arith.negf %19 : vector<8x256xf32>
    %21 = math.exp %20 : vector<8x256xf32>
    %cst_11 = arith.constant 1.000000e+00 : f32
    %22 = vector.broadcast %cst_11 : f32 to vector<8x256xf32>
    %23 = arith.addf %22, %21 : vector<8x256xf32>
    %24 = arith.divf %22, %23 : vector<8x256xf32>
    %25 = vector.extract_strided_slice %19 {offsets = [0, 128], sizes = [8, 64], strides = [1, 1]} : vector<8x256xf32> to vector<8x64xf32>
    %26 = math.tanh %25 : vector<8x64xf32>
    %27 = vector.extract_strided_slice %24 {offsets = [0, 0], sizes = [8, 64], strides = [1, 1]} : vector<8x256xf32> to vector<8x64xf32>
    %28 = vector.extract_strided_slice %24 {offsets = [0, 64], sizes = [8, 64], strides = [1, 1]} : vector<8x256xf32> to vector<8x64xf32>
    %29 = vector.extract_strided_slice %24 {offsets = [0, 192], sizes = [8, 64], strides = [1, 1]} : vector<8x256xf32> to vector<8x64xf32>
    %30 = arith.mulf %28, %14 : vector<8x64xf32>
    %31 = arith.mulf %27, %26 : vector<8x64xf32>
    %32 = arith.addf %30, %31 : vector<8x64xf32>
    %33 = math.tanh %32 : vector<8x64xf32>
    %34 = arith.mulf %29, %33 : vector<8x64xf32>
    %35 = vector.extract_strided_slice %34 {offsets = [0, 0], sizes = [8, 32], strides = [1, 1]} : vector<8x64xf32> to vector<8x32xf32>
    %c0_12 = arith.constant 0 : index
    %c0_13 = arith.constant 0 : index
    %36 = vector.load %arg13[%c0_12, %c0_13] : memref<64x64xf32, #tpu.memory_space<vmem>>, vector<8x32xf32>
    tpu.vector_store %arg13[%c0_12, %c0_13], %35 {strides = array<i32>} : memref<64x64xf32, #tpu.memory_space<vmem>>, vector<8x32xf32>,
    %37 = vector.extract_strided_slice %34 {offsets = [0, 32], sizes = [8, 32], strides = [1, 1]} : vector<8x64xf32> to vector<8x32xf32>
    %c56 = arith.constant 56 : index
    %c32 = arith.constant 32 : index
    %38 = vector.load %arg13[%c56, %c32] : memref<64x64xf32, #tpu.memory_space<vmem>>, vector<8x32xf32>
    tpu.vector_store %arg13[%c56, %c32], %37 {strides = array<i32>} : memref<64x64xf32, #tpu.memory_space<vmem>>, vector<8x32xf32>,
    %39 = vector.extract_strided_slice %7 {offsets = [8, 0], sizes = [8, 256], strides = [1, 1]} : vector<64x256xf32> to vector<8x256xf32>
    %40 = vector.extract_strided_slice %11 {offsets = [48, 0], sizes = [8, 256], strides = [1, 1]} : vector<64x256xf32> to vector<8x256xf32>
    %41 = arith.addf %39, %40 : vector<8x256xf32>
    %cst_14 = arith.constant dense<0.000000e+00> : vector<8x256xf32>
    %42 = tpu.matmul %34, %12, %cst_14 {dimension_numbers = #tpu.dot_dimension_numbers<[1], [0], [0], [1], [0, 0, 1, 1], [], []>} : vector<8x64xf32>, vector<64x256xf32>, vector<8x256xf32> -> vector<8x256xf32>
    %43 = arith.addf %41, %42 : vector<8x256xf32>
    %44 = arith.negf %43 : vector<8x256xf32>
    %45 = math.exp %44 : vector<8x256xf32>
    %cst_15 = arith.constant 1.000000e+00 : f32
    %46 = vector.broadcast %cst_15 : f32 to vector<8x256xf32>
    %47 = arith.addf %46, %45 : vector<8x256xf32>
    %48 = arith.divf %46, %47 : vector<8x256xf32>
    %49 = vector.extract_strided_slice %43 {offsets = [0, 128], sizes = [8, 64], strides = [1, 1]} : vector<8x256xf32> to vector<8x64xf32>
    %50 = math.tanh %49 : vector<8x64xf32>
    %51 = vector.extract_strided_slice %48 {offsets = [0, 0], sizes = [8, 64], strides = [1, 1]} : vector<8x256xf32> to vector<8x64xf32>
    %52 = vector.extract_strided_slice %48 {offsets = [0, 64], sizes = [8, 64], strides = [1, 1]} : vector<8x256xf32> to vector<8x64xf32>
    %53 = vector.extract_strided_slice %48 {offsets = [0, 192], sizes = [8, 64], strides = [1, 1]} : vector<8x256xf32> to vector<8x64xf32>
    %54 = arith.mulf %52, %32 : vector<8x64xf32>
    %55 = arith.mulf %51, %50 : vector<8x64xf32>
    %56 = arith.addf %54, %55 : vector<8x64xf32>
    %57 = math.tanh %56 : vector<8x64xf32>
    %58 = arith.mulf %53, %57 : vector<8x64xf32>
    %59 = vector.extract_strided_slice %58 {offsets = [0, 0], sizes = [8, 32], strides = [1, 1]} : vector<8x64xf32> to vector<8x32xf32>
    %c8 = arith.constant 8 : index
    %c0_16 = arith.constant 0 : index
    %60 = vector.load %arg13[%c8, %c0_16] : memref<64x64xf32, #tpu.memory_space<vmem>>, vector<8x32xf32>
    tpu.vector_store %arg13[%c8, %c0_16], %59 {strides = array<i32>} : memref<64x64xf32, #tpu.memory_space<vmem>>, vector<8x32xf32>,
    %61 = vector.extract_strided_slice %58 {offsets = [0, 32], sizes = [8, 32], strides = [1, 1]} : vector<8x64xf32> to vector<8x32xf32>
    %c48 = arith.constant 48 : index
    %c32_17 = arith.constant 32 : index
    %62 = vector.load %arg13[%c48, %c32_17] : memref<64x64xf32, #tpu.memory_space<vmem>>, vector<8x32xf32>
    tpu.vector_store %arg13[%c48, %c32_17], %61 {strides = array<i32>} : memref<64x64xf32, #tpu.memory_space<vmem>>, vector<8x32xf32>,
    %63 = vector.extract_strided_slice %7 {offsets = [16, 0], sizes = [8, 256], strides = [1, 1]} : vector<64x256xf32> to vector<8x256xf32>
    %64 = vector.extract_strided_slice %11 {offsets = [40, 0], sizes = [8, 256], strides = [1, 1]} : vector<64x256xf32> to vector<8x256xf32>
    %65 = arith.addf %63, %64 : vector<8x256xf32>
    %cst_18 = arith.constant dense<0.000000e+00> : vector<8x256xf32>
    %66 = tpu.matmul %58, %12, %cst_18 {dimension_numbers = #tpu.dot_dimension_numbers<[1], [0], [0], [1], [0, 0, 1, 1], [], []>} : vector<8x64xf32>, vector<64x256xf32>, vector<8x256xf32> -> vector<8x256xf32>
    %67 = arith.addf %65, %66 : vector<8x256xf32>
    %68 = arith.negf %67 : vector<8x256xf32>
    %69 = math.exp %68 : vector<8x256xf32>
    %cst_19 = arith.constant 1.000000e+00 : f32
    %70 = vector.broadcast %cst_19 : f32 to vector<8x256xf32>
    %71 = arith.addf %70, %69 : vector<8x256xf32>
    %72 = arith.divf %70, %71 : vector<8x256xf32>
    %73 = vector.extract_strided_slice %67 {offsets = [0, 128], sizes = [8, 64], strides = [1, 1]} : vector<8x256xf32> to vector<8x64xf32>
    %74 = math.tanh %73 : vector<8x64xf32>
    %75 = vector.extract_strided_slice %72 {offsets = [0, 0], sizes = [8, 64], strides = [1, 1]} : vector<8x256xf32> to vector<8x64xf32>
    %76 = vector.extract_strided_slice %72 {offsets = [0, 64], sizes = [8, 64], strides = [1, 1]} : vector<8x256xf32> to vector<8x64xf32>
    %77 = vector.extract_strided_slice %72 {offsets = [0, 192], sizes = [8, 64], strides = [1, 1]} : vector<8x256xf32> to vector<8x64xf32>
    %78 = arith.mulf %76, %56 : vector<8x64xf32>
    %79 = arith.mulf %75, %74 : vector<8x64xf32>
    %80 = arith.addf %78, %79 : vector<8x64xf32>
    %81 = math.tanh %80 : vector<8x64xf32>
    %82 = arith.mulf %77, %81 : vector<8x64xf32>
    %83 = vector.extract_strided_slice %82 {offsets = [0, 0], sizes = [8, 32], strides = [1, 1]} : vector<8x64xf32> to vector<8x32xf32>
    %c16 = arith.constant 16 : index
    %c0_20 = arith.constant 0 : index
    %84 = vector.load %arg13[%c16, %c0_20] : memref<64x64xf32, #tpu.memory_space<vmem>>, vector<8x32xf32>
    tpu.vector_store %arg13[%c16, %c0_20], %83 {strides = array<i32>} : memref<64x64xf32, #tpu.memory_space<vmem>>, vector<8x32xf32>,
    %85 = vector.extract_strided_slice %82 {offsets = [0, 32], sizes = [8, 32], strides = [1, 1]} : vector<8x64xf32> to vector<8x32xf32>
    %c40 = arith.constant 40 : index
    %c32_21 = arith.constant 32 : index
    %86 = vector.load %arg13[%c40, %c32_21] : memref<64x64xf32, #tpu.memory_space<vmem>>, vector<8x32xf32>
    tpu.vector_store %arg13[%c40, %c32_21], %85 {strides = array<i32>} : memref<64x64xf32, #tpu.memory_space<vmem>>, vector<8x32xf32>,
    %87 = vector.extract_strided_slice %7 {offsets = [24, 0], sizes = [8, 256], strides = [1, 1]} : vector<64x256xf32> to vector<8x256xf32>
    %88 = vector.extract_strided_slice %11 {offsets = [32, 0], sizes = [8, 256], strides = [1, 1]} : vector<64x256xf32> to vector<8x256xf32>
    %89 = arith.addf %87, %88 : vector<8x256xf32>
    %cst_22 = arith.constant dense<0.000000e+00> : vector<8x256xf32>
    %90 = tpu.matmul %82, %12, %cst_22 {dimension_numbers = #tpu.dot_dimension_numbers<[1], [0], [0], [1], [0, 0, 1, 1], [], []>} : vector<8x64xf32>, vector<64x256xf32>, vector<8x256xf32> -> vector<8x256xf32>
    %91 = arith.addf %89, %90 : vector<8x256xf32>
    %92 = arith.negf %91 : vector<8x256xf32>
    %93 = math.exp %92 : vector<8x256xf32>
    %cst_23 = arith.constant 1.000000e+00 : f32
    %94 = vector.broadcast %cst_23 : f32 to vector<8x256xf32>
    %95 = arith.addf %94, %93 : vector<8x256xf32>
    %96 = arith.divf %94, %95 : vector<8x256xf32>
    %97 = vector.extract_strided_slice %91 {offsets = [0, 128], sizes = [8, 64], strides = [1, 1]} : vector<8x256xf32> to vector<8x64xf32>
    %98 = math.tanh %97 : vector<8x64xf32>
    %99 = vector.extract_strided_slice %96 {offsets = [0, 0], sizes = [8, 64], strides = [1, 1]} : vector<8x256xf32> to vector<8x64xf32>
    %100 = vector.extract_strided_slice %96 {offsets = [0, 64], sizes = [8, 64], strides = [1, 1]} : vector<8x256xf32> to vector<8x64xf32>
    %101 = vector.extract_strided_slice %96 {offsets = [0, 192], sizes = [8, 64], strides = [1, 1]} : vector<8x256xf32> to vector<8x64xf32>
    %102 = arith.mulf %100, %80 : vector<8x64xf32>
    %103 = arith.mulf %99, %98 : vector<8x64xf32>
    %104 = arith.addf %102, %103 : vector<8x64xf32>
    %105 = math.tanh %104 : vector<8x64xf32>
    %106 = arith.mulf %101, %105 : vector<8x64xf32>
    %107 = vector.extract_strided_slice %106 {offsets = [0, 0], sizes = [8, 32], strides = [1, 1]} : vector<8x64xf32> to vector<8x32xf32>
    %c24 = arith.constant 24 : index
    %c0_24 = arith.constant 0 : index
    %108 = vector.load %arg13[%c24, %c0_24] : memref<64x64xf32, #tpu.memory_space<vmem>>, vector<8x32xf32>
    tpu.vector_store %arg13[%c24, %c0_24], %107 {strides = array<i32>} : memref<64x64xf32, #tpu.memory_space<vmem>>, vector<8x32xf32>,
    %109 = vector.extract_strided_slice %106 {offsets = [0, 32], sizes = [8, 32], strides = [1, 1]} : vector<8x64xf32> to vector<8x32xf32>
    %c32_25 = arith.constant 32 : index
    %c32_26 = arith.constant 32 : index
    %110 = vector.load %arg13[%c32_25, %c32_26] : memref<64x64xf32, #tpu.memory_space<vmem>>, vector<8x32xf32>
    tpu.vector_store %arg13[%c32_25, %c32_26], %109 {strides = array<i32>} : memref<64x64xf32, #tpu.memory_space<vmem>>, vector<8x32xf32>,
    %111 = vector.extract_strided_slice %7 {offsets = [32, 0], sizes = [8, 256], strides = [1, 1]} : vector<64x256xf32> to vector<8x256xf32>
    %112 = vector.extract_strided_slice %11 {offsets = [24, 0], sizes = [8, 256], strides = [1, 1]} : vector<64x256xf32> to vector<8x256xf32>
    %113 = arith.addf %111, %112 : vector<8x256xf32>
    %cst_27 = arith.constant dense<0.000000e+00> : vector<8x256xf32>
    %114 = tpu.matmul %106, %12, %cst_27 {dimension_numbers = #tpu.dot_dimension_numbers<[1], [0], [0], [1], [0, 0, 1, 1], [], []>} : vector<8x64xf32>, vector<64x256xf32>, vector<8x256xf32> -> vector<8x256xf32>
    %115 = arith.addf %113, %114 : vector<8x256xf32>
    %116 = arith.negf %115 : vector<8x256xf32>
    %117 = math.exp %116 : vector<8x256xf32>
    %cst_28 = arith.constant 1.000000e+00 : f32
    %118 = vector.broadcast %cst_28 : f32 to vector<8x256xf32>
    %119 = arith.addf %118, %117 : vector<8x256xf32>
    %120 = arith.divf %118, %119 : vector<8x256xf32>
    %121 = vector.extract_strided_slice %115 {offsets = [0, 128], sizes = [8, 64], strides = [1, 1]} : vector<8x256xf32> to vector<8x64xf32>
    %122 = math.tanh %121 : vector<8x64xf32>
    %123 = vector.extract_strided_slice %120 {offsets = [0, 0], sizes = [8, 64], strides = [1, 1]} : vector<8x256xf32> to vector<8x64xf32>
    %124 = vector.extract_strided_slice %120 {offsets = [0, 64], sizes = [8, 64], strides = [1, 1]} : vector<8x256xf32> to vector<8x64xf32>
    %125 = vector.extract_strided_slice %120 {offsets = [0, 192], sizes = [8, 64], strides = [1, 1]} : vector<8x256xf32> to vector<8x64xf32>
    %126 = arith.mulf %124, %104 : vector<8x64xf32>
    %127 = arith.mulf %123, %122 : vector<8x64xf32>
    %128 = arith.addf %126, %127 : vector<8x64xf32>
    %129 = math.tanh %128 : vector<8x64xf32>
    %130 = arith.mulf %125, %129 : vector<8x64xf32>
    %131 = vector.extract_strided_slice %130 {offsets = [0, 0], sizes = [8, 32], strides = [1, 1]} : vector<8x64xf32> to vector<8x32xf32>
    %c32_29 = arith.constant 32 : index
    %c0_30 = arith.constant 0 : index
    %132 = vector.load %arg13[%c32_29, %c0_30] : memref<64x64xf32, #tpu.memory_space<vmem>>, vector<8x32xf32>
    tpu.vector_store %arg13[%c32_29, %c0_30], %131 {strides = array<i32>} : memref<64x64xf32, #tpu.memory_space<vmem>>, vector<8x32xf32>,
    %133 = vector.extract_strided_slice %130 {offsets = [0, 32], sizes = [8, 32], strides = [1, 1]} : vector<8x64xf32> to vector<8x32xf32>
    %c24_31 = arith.constant 24 : index
    %c32_32 = arith.constant 32 : index
    %134 = vector.load %arg13[%c24_31, %c32_32] : memref<64x64xf32, #tpu.memory_space<vmem>>, vector<8x32xf32>
    tpu.vector_store %arg13[%c24_31, %c32_32], %133 {strides = array<i32>} : memref<64x64xf32, #tpu.memory_space<vmem>>, vector<8x32xf32>,
    %135 = vector.extract_strided_slice %7 {offsets = [40, 0], sizes = [8, 256], strides = [1, 1]} : vector<64x256xf32> to vector<8x256xf32>
    %136 = vector.extract_strided_slice %11 {offsets = [16, 0], sizes = [8, 256], strides = [1, 1]} : vector<64x256xf32> to vector<8x256xf32>
    %137 = arith.addf %135, %136 : vector<8x256xf32>
    %cst_33 = arith.constant dense<0.000000e+00> : vector<8x256xf32>
    %138 = tpu.matmul %130, %12, %cst_33 {dimension_numbers = #tpu.dot_dimension_numbers<[1], [0], [0], [1], [0, 0, 1, 1], [], []>} : vector<8x64xf32>, vector<64x256xf32>, vector<8x256xf32> -> vector<8x256xf32>
    %139 = arith.addf %137, %138 : vector<8x256xf32>
    %140 = arith.negf %139 : vector<8x256xf32>
    %141 = math.exp %140 : vector<8x256xf32>
    %cst_34 = arith.constant 1.000000e+00 : f32
    %142 = vector.broadcast %cst_34 : f32 to vector<8x256xf32>
    %143 = arith.addf %142, %141 : vector<8x256xf32>
    %144 = arith.divf %142, %143 : vector<8x256xf32>
    %145 = vector.extract_strided_slice %139 {offsets = [0, 128], sizes = [8, 64], strides = [1, 1]} : vector<8x256xf32> to vector<8x64xf32>
    %146 = math.tanh %145 : vector<8x64xf32>
    %147 = vector.extract_strided_slice %144 {offsets = [0, 0], sizes = [8, 64], strides = [1, 1]} : vector<8x256xf32> to vector<8x64xf32>
    %148 = vector.extract_strided_slice %144 {offsets = [0, 64], sizes = [8, 64], strides = [1, 1]} : vector<8x256xf32> to vector<8x64xf32>
    %149 = vector.extract_strided_slice %144 {offsets = [0, 192], sizes = [8, 64], strides = [1, 1]} : vector<8x256xf32> to vector<8x64xf32>
    %150 = arith.mulf %148, %128 : vector<8x64xf32>
    %151 = arith.mulf %147, %146 : vector<8x64xf32>
    %152 = arith.addf %150, %151 : vector<8x64xf32>
    %153 = math.tanh %152 : vector<8x64xf32>
    %154 = arith.mulf %149, %153 : vector<8x64xf32>
    %155 = vector.extract_strided_slice %154 {offsets = [0, 0], sizes = [8, 32], strides = [1, 1]} : vector<8x64xf32> to vector<8x32xf32>
    %c40_35 = arith.constant 40 : index
    %c0_36 = arith.constant 0 : index
    %156 = vector.load %arg13[%c40_35, %c0_36] : memref<64x64xf32, #tpu.memory_space<vmem>>, vector<8x32xf32>
    tpu.vector_store %arg13[%c40_35, %c0_36], %155 {strides = array<i32>} : memref<64x64xf32, #tpu.memory_space<vmem>>, vector<8x32xf32>,
    %157 = vector.extract_strided_slice %154 {offsets = [0, 32], sizes = [8, 32], strides = [1, 1]} : vector<8x64xf32> to vector<8x32xf32>
    %c16_37 = arith.constant 16 : index
    %c32_38 = arith.constant 32 : index
    %158 = vector.load %arg13[%c16_37, %c32_38] : memref<64x64xf32, #tpu.memory_space<vmem>>, vector<8x32xf32>
    tpu.vector_store %arg13[%c16_37, %c32_38], %157 {strides = array<i32>} : memref<64x64xf32, #tpu.memory_space<vmem>>, vector<8x32xf32>,
    %159 = vector.extract_strided_slice %7 {offsets = [48, 0], sizes = [8, 256], strides = [1, 1]} : vector<64x256xf32> to vector<8x256xf32>
    %160 = vector.extract_strided_slice %11 {offsets = [8, 0], sizes = [8, 256], strides = [1, 1]} : vector<64x256xf32> to vector<8x256xf32>
    %161 = arith.addf %159, %160 : vector<8x256xf32>
    %cst_39 = arith.constant dense<0.000000e+00> : vector<8x256xf32>
    %162 = tpu.matmul %154, %12, %cst_39 {dimension_numbers = #tpu.dot_dimension_numbers<[1], [0], [0], [1], [0, 0, 1, 1], [], []>} : vector<8x64xf32>, vector<64x256xf32>, vector<8x256xf32> -> vector<8x256xf32>
    %163 = arith.addf %161, %162 : vector<8x256xf32>
    %164 = arith.negf %163 : vector<8x256xf32>
    %165 = math.exp %164 : vector<8x256xf32>
    %cst_40 = arith.constant 1.000000e+00 : f32
    %166 = vector.broadcast %cst_40 : f32 to vector<8x256xf32>
    %167 = arith.addf %166, %165 : vector<8x256xf32>
    %168 = arith.divf %166, %167 : vector<8x256xf32>
    %169 = vector.extract_strided_slice %163 {offsets = [0, 128], sizes = [8, 64], strides = [1, 1]} : vector<8x256xf32> to vector<8x64xf32>
    %170 = math.tanh %169 : vector<8x64xf32>
    %171 = vector.extract_strided_slice %168 {offsets = [0, 0], sizes = [8, 64], strides = [1, 1]} : vector<8x256xf32> to vector<8x64xf32>
    %172 = vector.extract_strided_slice %168 {offsets = [0, 64], sizes = [8, 64], strides = [1, 1]} : vector<8x256xf32> to vector<8x64xf32>
    %173 = vector.extract_strided_slice %168 {offsets = [0, 192], sizes = [8, 64], strides = [1, 1]} : vector<8x256xf32> to vector<8x64xf32>
    %174 = arith.mulf %172, %152 : vector<8x64xf32>
    %175 = arith.mulf %171, %170 : vector<8x64xf32>
    %176 = arith.addf %174, %175 : vector<8x64xf32>
    %177 = math.tanh %176 : vector<8x64xf32>
    %178 = arith.mulf %173, %177 : vector<8x64xf32>
    %179 = vector.extract_strided_slice %178 {offsets = [0, 0], sizes = [8, 32], strides = [1, 1]} : vector<8x64xf32> to vector<8x32xf32>
    %c48_41 = arith.constant 48 : index
    %c0_42 = arith.constant 0 : index
    %180 = vector.load %arg13[%c48_41, %c0_42] : memref<64x64xf32, #tpu.memory_space<vmem>>, vector<8x32xf32>
    tpu.vector_store %arg13[%c48_41, %c0_42], %179 {strides = array<i32>} : memref<64x64xf32, #tpu.memory_space<vmem>>, vector<8x32xf32>,
    %181 = vector.extract_strided_slice %178 {offsets = [0, 32], sizes = [8, 32], strides = [1, 1]} : vector<8x64xf32> to vector<8x32xf32>
    %c8_43 = arith.constant 8 : index
    %c32_44 = arith.constant 32 : index
    %182 = vector.load %arg13[%c8_43, %c32_44] : memref<64x64xf32, #tpu.memory_space<vmem>>, vector<8x32xf32>
    tpu.vector_store %arg13[%c8_43, %c32_44], %181 {strides = array<i32>} : memref<64x64xf32, #tpu.memory_space<vmem>>, vector<8x32xf32>,
    %183 = vector.extract_strided_slice %7 {offsets = [56, 0], sizes = [8, 256], strides = [1, 1]} : vector<64x256xf32> to vector<8x256xf32>
    %184 = vector.extract_strided_slice %11 {offsets = [0, 0], sizes = [8, 256], strides = [1, 1]} : vector<64x256xf32> to vector<8x256xf32>
    %185 = arith.addf %183, %184 : vector<8x256xf32>
    %cst_45 = arith.constant dense<0.000000e+00> : vector<8x256xf32>
    %186 = tpu.matmul %178, %12, %cst_45 {dimension_numbers = #tpu.dot_dimension_numbers<[1], [0], [0], [1], [0, 0, 1, 1], [], []>} : vector<8x64xf32>, vector<64x256xf32>, vector<8x256xf32> -> vector<8x256xf32>
    %187 = arith.addf %185, %186 : vector<8x256xf32>
    %188 = arith.negf %187 : vector<8x256xf32>
    %189 = math.exp %188 : vector<8x256xf32>
    %cst_46 = arith.constant 1.000000e+00 : f32
    %190 = vector.broadcast %cst_46 : f32 to vector<8x256xf32>
    %191 = arith.addf %190, %189 : vector<8x256xf32>
    %192 = arith.divf %190, %191 : vector<8x256xf32>
    %193 = vector.extract_strided_slice %187 {offsets = [0, 128], sizes = [8, 64], strides = [1, 1]} : vector<8x256xf32> to vector<8x64xf32>
    %194 = math.tanh %193 : vector<8x64xf32>
    %195 = vector.extract_strided_slice %192 {offsets = [0, 0], sizes = [8, 64], strides = [1, 1]} : vector<8x256xf32> to vector<8x64xf32>
    %196 = vector.extract_strided_slice %192 {offsets = [0, 64], sizes = [8, 64], strides = [1, 1]} : vector<8x256xf32> to vector<8x64xf32>
    %197 = vector.extract_strided_slice %192 {offsets = [0, 192], sizes = [8, 64], strides = [1, 1]} : vector<8x256xf32> to vector<8x64xf32>
    %198 = arith.mulf %196, %176 : vector<8x64xf32>
    %199 = arith.mulf %195, %194 : vector<8x64xf32>
    %200 = arith.addf %198, %199 : vector<8x64xf32>
    %201 = math.tanh %200 : vector<8x64xf32>
    %202 = arith.mulf %197, %201 : vector<8x64xf32>
    %203 = vector.extract_strided_slice %202 {offsets = [0, 0], sizes = [8, 32], strides = [1, 1]} : vector<8x64xf32> to vector<8x32xf32>
    %c56_47 = arith.constant 56 : index
    %c0_48 = arith.constant 0 : index
    %204 = vector.load %arg13[%c56_47, %c0_48] : memref<64x64xf32, #tpu.memory_space<vmem>>, vector<8x32xf32>
    tpu.vector_store %arg13[%c56_47, %c0_48], %203 {strides = array<i32>} : memref<64x64xf32, #tpu.memory_space<vmem>>, vector<8x32xf32>,
    %205 = vector.extract_strided_slice %202 {offsets = [0, 32], sizes = [8, 32], strides = [1, 1]} : vector<8x64xf32> to vector<8x32xf32>
    %c0_49 = arith.constant 0 : index
    %c32_50 = arith.constant 32 : index
    %206 = vector.load %arg13[%c0_49, %c32_50] : memref<64x64xf32, #tpu.memory_space<vmem>>, vector<8x32xf32>
    tpu.vector_store %arg13[%c0_49, %c32_50], %205 {strides = array<i32>} : memref<64x64xf32, #tpu.memory_space<vmem>>, vector<8x32xf32>,
    %c0_51 = arith.constant 0 : index
    %c0_52 = arith.constant 0 : index
    %207 = vector.load %arg13[%c0_51, %c0_52] : memref<64x64xf32, #tpu.memory_space<vmem>>, vector<64x64xf32>
    %c0_53 = arith.constant 0 : index
    %c0_54 = arith.constant 0 : index
    %208 = vector.load %arg6[%c0_53, %c0_54] : memref<64x256xf32, #tpu.memory_space<vmem>>, vector<64x256xf32>
    %cst_55 = arith.constant dense<0.000000e+00> : vector<64x256xf32>
    %209 = tpu.matmul %207, %208, %cst_55 {dimension_numbers = #tpu.dot_dimension_numbers<[1], [0], [0], [1], [0, 0, 1, 1], [], []>} : vector<64x64xf32>, vector<64x256xf32>, vector<64x256xf32> -> vector<64x256xf32>
    %c0_56 = arith.constant 0 : index
    %c0_57 = arith.constant 0 : index
    %210 = vector.load %arg9[%c0_56, %c0_57] : memref<1x256xf32, #tpu.memory_space<vmem>>, vector<1x256xf32>
    %211 = vector.broadcast %210 : vector<1x256xf32> to vector<64x256xf32>
    %212 = arith.addf %209, %211 : vector<64x256xf32>
    %c0_58 = arith.constant 0 : index
    %c0_59 = arith.constant 0 : index
    %213 = vector.load %arg7[%c0_58, %c0_59] : memref<64x256xf32, #tpu.memory_space<vmem>>, vector<64x256xf32>
    %cst_60 = arith.constant dense<0.000000e+00> : vector<64x256xf32>
    %214 = tpu.matmul %207, %213, %cst_60 {dimension_numbers = #tpu.dot_dimension_numbers<[1], [0], [0], [1], [0, 0, 1, 1], [], []>} : vector<64x64xf32>, vector<64x256xf32>, vector<64x256xf32> -> vector<64x256xf32>
    %c0_61 = arith.constant 0 : index
    %c0_62 = arith.constant 0 : index
    %215 = vector.load %arg8[%c0_61, %c0_62] : memref<64x256xf32, #tpu.memory_space<vmem>>, vector<64x256xf32>
    %cst_63 = arith.constant 0.000000e+00 : f32
    %216 = vector.broadcast %cst_63 : f32 to vector<8x64xf32>
    %cst_64 = arith.constant 0.000000e+00 : f32
    %217 = vector.broadcast %cst_64 : f32 to vector<8x64xf32>
    %218 = vector.extract_strided_slice %212 {offsets = [0, 0], sizes = [8, 256], strides = [1, 1]} : vector<64x256xf32> to vector<8x256xf32>
    %219 = vector.extract_strided_slice %214 {offsets = [56, 0], sizes = [8, 256], strides = [1, 1]} : vector<64x256xf32> to vector<8x256xf32>
    %220 = arith.addf %218, %219 : vector<8x256xf32>
    %cst_65 = arith.constant dense<0.000000e+00> : vector<8x256xf32>
    %221 = tpu.matmul %216, %215, %cst_65 {dimension_numbers = #tpu.dot_dimension_numbers<[1], [0], [0], [1], [0, 0, 1, 1], [], []>} : vector<8x64xf32>, vector<64x256xf32>, vector<8x256xf32> -> vector<8x256xf32>
    %222 = arith.addf %220, %221 : vector<8x256xf32>
    %223 = arith.negf %222 : vector<8x256xf32>
    %224 = math.exp %223 : vector<8x256xf32>
    %cst_66 = arith.constant 1.000000e+00 : f32
    %225 = vector.broadcast %cst_66 : f32 to vector<8x256xf32>
    %226 = arith.addf %225, %224 : vector<8x256xf32>
    %227 = arith.divf %225, %226 : vector<8x256xf32>
    %228 = vector.extract_strided_slice %222 {offsets = [0, 128], sizes = [8, 64], strides = [1, 1]} : vector<8x256xf32> to vector<8x64xf32>
    %229 = math.tanh %228 : vector<8x64xf32>
    %230 = vector.extract_strided_slice %227 {offsets = [0, 0], sizes = [8, 64], strides = [1, 1]} : vector<8x256xf32> to vector<8x64xf32>
    %231 = vector.extract_strided_slice %227 {offsets = [0, 64], sizes = [8, 64], strides = [1, 1]} : vector<8x256xf32> to vector<8x64xf32>
    %232 = vector.extract_strided_slice %227 {offsets = [0, 192], sizes = [8, 64], strides = [1, 1]} : vector<8x256xf32> to vector<8x64xf32>
    %233 = arith.mulf %231, %217 : vector<8x64xf32>
    %234 = arith.mulf %230, %229 : vector<8x64xf32>
    %235 = arith.addf %233, %234 : vector<8x64xf32>
    %236 = math.tanh %235 : vector<8x64xf32>
    %237 = arith.mulf %232, %236 : vector<8x64xf32>
    %238 = vector.extract_strided_slice %237 {offsets = [0, 32], sizes = [8, 32], strides = [1, 1]} : vector<8x64xf32> to vector<8x32xf32>
    %239 = vector.extract_strided_slice %212 {offsets = [8, 0], sizes = [8, 256], strides = [1, 1]} : vector<64x256xf32> to vector<8x256xf32>
    %240 = vector.extract_strided_slice %214 {offsets = [48, 0], sizes = [8, 256], strides = [1, 1]} : vector<64x256xf32> to vector<8x256xf32>
    %241 = arith.addf %239, %240 : vector<8x256xf32>
    %cst_67 = arith.constant dense<0.000000e+00> : vector<8x256xf32>
    %242 = tpu.matmul %237, %215, %cst_67 {dimension_numbers = #tpu.dot_dimension_numbers<[1], [0], [0], [1], [0, 0, 1, 1], [], []>} : vector<8x64xf32>, vector<64x256xf32>, vector<8x256xf32> -> vector<8x256xf32>
    %243 = arith.addf %241, %242 : vector<8x256xf32>
    %244 = arith.negf %243 : vector<8x256xf32>
    %245 = math.exp %244 : vector<8x256xf32>
    %cst_68 = arith.constant 1.000000e+00 : f32
    %246 = vector.broadcast %cst_68 : f32 to vector<8x256xf32>
    %247 = arith.addf %246, %245 : vector<8x256xf32>
    %248 = arith.divf %246, %247 : vector<8x256xf32>
    %249 = vector.extract_strided_slice %243 {offsets = [0, 128], sizes = [8, 64], strides = [1, 1]} : vector<8x256xf32> to vector<8x64xf32>
    %250 = math.tanh %249 : vector<8x64xf32>
    %251 = vector.extract_strided_slice %248 {offsets = [0, 0], sizes = [8, 64], strides = [1, 1]} : vector<8x256xf32> to vector<8x64xf32>
    %252 = vector.extract_strided_slice %248 {offsets = [0, 64], sizes = [8, 64], strides = [1, 1]} : vector<8x256xf32> to vector<8x64xf32>
    %253 = vector.extract_strided_slice %248 {offsets = [0, 192], sizes = [8, 64], strides = [1, 1]} : vector<8x256xf32> to vector<8x64xf32>
    %254 = arith.mulf %252, %235 : vector<8x64xf32>
    %255 = arith.mulf %251, %250 : vector<8x64xf32>
    %256 = arith.addf %254, %255 : vector<8x64xf32>
    %257 = math.tanh %256 : vector<8x64xf32>
    %258 = arith.mulf %253, %257 : vector<8x64xf32>
    %259 = vector.extract_strided_slice %212 {offsets = [16, 0], sizes = [8, 256], strides = [1, 1]} : vector<64x256xf32> to vector<8x256xf32>
    %260 = vector.extract_strided_slice %214 {offsets = [40, 0], sizes = [8, 256], strides = [1, 1]} : vector<64x256xf32> to vector<8x256xf32>
    %261 = arith.addf %259, %260 : vector<8x256xf32>
    %cst_69 = arith.constant dense<0.000000e+00> : vector<8x256xf32>
    %262 = tpu.matmul %258, %215, %cst_69 {dimension_numbers = #tpu.dot_dimension_numbers<[1], [0], [0], [1], [0, 0, 1, 1], [], []>} : vector<8x64xf32>, vector<64x256xf32>, vector<8x256xf32> -> vector<8x256xf32>
    %263 = arith.addf %261, %262 : vector<8x256xf32>
    %264 = arith.negf %263 : vector<8x256xf32>
    %265 = math.exp %264 : vector<8x256xf32>
    %cst_70 = arith.constant 1.000000e+00 : f32
    %266 = vector.broadcast %cst_70 : f32 to vector<8x256xf32>
    %267 = arith.addf %266, %265 : vector<8x256xf32>
    %268 = arith.divf %266, %267 : vector<8x256xf32>
    %269 = vector.extract_strided_slice %263 {offsets = [0, 128], sizes = [8, 64], strides = [1, 1]} : vector<8x256xf32> to vector<8x64xf32>
    %270 = math.tanh %269 : vector<8x64xf32>
    %271 = vector.extract_strided_slice %268 {offsets = [0, 0], sizes = [8, 64], strides = [1, 1]} : vector<8x256xf32> to vector<8x64xf32>
    %272 = vector.extract_strided_slice %268 {offsets = [0, 64], sizes = [8, 64], strides = [1, 1]} : vector<8x256xf32> to vector<8x64xf32>
    %273 = vector.extract_strided_slice %268 {offsets = [0, 192], sizes = [8, 64], strides = [1, 1]} : vector<8x256xf32> to vector<8x64xf32>
    %274 = arith.mulf %272, %256 : vector<8x64xf32>
    %275 = arith.mulf %271, %270 : vector<8x64xf32>
    %276 = arith.addf %274, %275 : vector<8x64xf32>
    %277 = math.tanh %276 : vector<8x64xf32>
    %278 = arith.mulf %273, %277 : vector<8x64xf32>
    %279 = vector.extract_strided_slice %212 {offsets = [24, 0], sizes = [8, 256], strides = [1, 1]} : vector<64x256xf32> to vector<8x256xf32>
    %280 = vector.extract_strided_slice %214 {offsets = [32, 0], sizes = [8, 256], strides = [1, 1]} : vector<64x256xf32> to vector<8x256xf32>
    %281 = arith.addf %279, %280 : vector<8x256xf32>
    %cst_71 = arith.constant dense<0.000000e+00> : vector<8x256xf32>
    %282 = tpu.matmul %278, %215, %cst_71 {dimension_numbers = #tpu.dot_dimension_numbers<[1], [0], [0], [1], [0, 0, 1, 1], [], []>} : vector<8x64xf32>, vector<64x256xf32>, vector<8x256xf32> -> vector<8x256xf32>
    %283 = arith.addf %281, %282 : vector<8x256xf32>
    %284 = arith.negf %283 : vector<8x256xf32>
    %285 = math.exp %284 : vector<8x256xf32>
    %cst_72 = arith.constant 1.000000e+00 : f32
    %286 = vector.broadcast %cst_72 : f32 to vector<8x256xf32>
    %287 = arith.addf %286, %285 : vector<8x256xf32>
    %288 = arith.divf %286, %287 : vector<8x256xf32>
    %289 = vector.extract_strided_slice %283 {offsets = [0, 128], sizes = [8, 64], strides = [1, 1]} : vector<8x256xf32> to vector<8x64xf32>
    %290 = math.tanh %289 : vector<8x64xf32>
    %291 = vector.extract_strided_slice %288 {offsets = [0, 0], sizes = [8, 64], strides = [1, 1]} : vector<8x256xf32> to vector<8x64xf32>
    %292 = vector.extract_strided_slice %288 {offsets = [0, 64], sizes = [8, 64], strides = [1, 1]} : vector<8x256xf32> to vector<8x64xf32>
    %293 = vector.extract_strided_slice %288 {offsets = [0, 192], sizes = [8, 64], strides = [1, 1]} : vector<8x256xf32> to vector<8x64xf32>
    %294 = arith.mulf %292, %276 : vector<8x64xf32>
    %295 = arith.mulf %291, %290 : vector<8x64xf32>
    %296 = arith.addf %294, %295 : vector<8x64xf32>
    %297 = math.tanh %296 : vector<8x64xf32>
    %298 = arith.mulf %293, %297 : vector<8x64xf32>
    %299 = vector.extract_strided_slice %212 {offsets = [32, 0], sizes = [8, 256], strides = [1, 1]} : vector<64x256xf32> to vector<8x256xf32>
    %300 = vector.extract_strided_slice %214 {offsets = [24, 0], sizes = [8, 256], strides = [1, 1]} : vector<64x256xf32> to vector<8x256xf32>
    %301 = arith.addf %299, %300 : vector<8x256xf32>
    %cst_73 = arith.constant dense<0.000000e+00> : vector<8x256xf32>
    %302 = tpu.matmul %298, %215, %cst_73 {dimension_numbers = #tpu.dot_dimension_numbers<[1], [0], [0], [1], [0, 0, 1, 1], [], []>} : vector<8x64xf32>, vector<64x256xf32>, vector<8x256xf32> -> vector<8x256xf32>
    %303 = arith.addf %301, %302 : vector<8x256xf32>
    %304 = arith.negf %303 : vector<8x256xf32>
    %305 = math.exp %304 : vector<8x256xf32>
    %cst_74 = arith.constant 1.000000e+00 : f32
    %306 = vector.broadcast %cst_74 : f32 to vector<8x256xf32>
    %307 = arith.addf %306, %305 : vector<8x256xf32>
    %308 = arith.divf %306, %307 : vector<8x256xf32>
    %309 = vector.extract_strided_slice %303 {offsets = [0, 128], sizes = [8, 64], strides = [1, 1]} : vector<8x256xf32> to vector<8x64xf32>
    %310 = math.tanh %309 : vector<8x64xf32>
    %311 = vector.extract_strided_slice %308 {offsets = [0, 0], sizes = [8, 64], strides = [1, 1]} : vector<8x256xf32> to vector<8x64xf32>
    %312 = vector.extract_strided_slice %308 {offsets = [0, 64], sizes = [8, 64], strides = [1, 1]} : vector<8x256xf32> to vector<8x64xf32>
    %313 = vector.extract_strided_slice %308 {offsets = [0, 192], sizes = [8, 64], strides = [1, 1]} : vector<8x256xf32> to vector<8x64xf32>
    %314 = arith.mulf %312, %296 : vector<8x64xf32>
    %315 = arith.mulf %311, %310 : vector<8x64xf32>
    %316 = arith.addf %314, %315 : vector<8x64xf32>
    %317 = math.tanh %316 : vector<8x64xf32>
    %318 = arith.mulf %313, %317 : vector<8x64xf32>
    %319 = vector.extract_strided_slice %212 {offsets = [40, 0], sizes = [8, 256], strides = [1, 1]} : vector<64x256xf32> to vector<8x256xf32>
    %320 = vector.extract_strided_slice %214 {offsets = [16, 0], sizes = [8, 256], strides = [1, 1]} : vector<64x256xf32> to vector<8x256xf32>
    %321 = arith.addf %319, %320 : vector<8x256xf32>
    %cst_75 = arith.constant dense<0.000000e+00> : vector<8x256xf32>
    %322 = tpu.matmul %318, %215, %cst_75 {dimension_numbers = #tpu.dot_dimension_numbers<[1], [0], [0], [1], [0, 0, 1, 1], [], []>} : vector<8x64xf32>, vector<64x256xf32>, vector<8x256xf32> -> vector<8x256xf32>
    %323 = arith.addf %321, %322 : vector<8x256xf32>
    %324 = arith.negf %323 : vector<8x256xf32>
    %325 = math.exp %324 : vector<8x256xf32>
    %cst_76 = arith.constant 1.000000e+00 : f32
    %326 = vector.broadcast %cst_76 : f32 to vector<8x256xf32>
    %327 = arith.addf %326, %325 : vector<8x256xf32>
    %328 = arith.divf %326, %327 : vector<8x256xf32>
    %329 = vector.extract_strided_slice %323 {offsets = [0, 128], sizes = [8, 64], strides = [1, 1]} : vector<8x256xf32> to vector<8x64xf32>
    %330 = math.tanh %329 : vector<8x64xf32>
    %331 = vector.extract_strided_slice %328 {offsets = [0, 0], sizes = [8, 64], strides = [1, 1]} : vector<8x256xf32> to vector<8x64xf32>
    %332 = vector.extract_strided_slice %328 {offsets = [0, 64], sizes = [8, 64], strides = [1, 1]} : vector<8x256xf32> to vector<8x64xf32>
    %333 = vector.extract_strided_slice %328 {offsets = [0, 192], sizes = [8, 64], strides = [1, 1]} : vector<8x256xf32> to vector<8x64xf32>
    %334 = arith.mulf %332, %316 : vector<8x64xf32>
    %335 = arith.mulf %331, %330 : vector<8x64xf32>
    %336 = arith.addf %334, %335 : vector<8x64xf32>
    %337 = math.tanh %336 : vector<8x64xf32>
    %338 = arith.mulf %333, %337 : vector<8x64xf32>
    %339 = vector.extract_strided_slice %212 {offsets = [48, 0], sizes = [8, 256], strides = [1, 1]} : vector<64x256xf32> to vector<8x256xf32>
    %340 = vector.extract_strided_slice %214 {offsets = [8, 0], sizes = [8, 256], strides = [1, 1]} : vector<64x256xf32> to vector<8x256xf32>
    %341 = arith.addf %339, %340 : vector<8x256xf32>
    %cst_77 = arith.constant dense<0.000000e+00> : vector<8x256xf32>
    %342 = tpu.matmul %338, %215, %cst_77 {dimension_numbers = #tpu.dot_dimension_numbers<[1], [0], [0], [1], [0, 0, 1, 1], [], []>} : vector<8x64xf32>, vector<64x256xf32>, vector<8x256xf32> -> vector<8x256xf32>
    %343 = arith.addf %341, %342 : vector<8x256xf32>
    %344 = arith.negf %343 : vector<8x256xf32>
    %345 = math.exp %344 : vector<8x256xf32>
    %cst_78 = arith.constant 1.000000e+00 : f32
    %346 = vector.broadcast %cst_78 : f32 to vector<8x256xf32>
    %347 = arith.addf %346, %345 : vector<8x256xf32>
    %348 = arith.divf %346, %347 : vector<8x256xf32>
    %349 = vector.extract_strided_slice %343 {offsets = [0, 128], sizes = [8, 64], strides = [1, 1]} : vector<8x256xf32> to vector<8x64xf32>
    %350 = math.tanh %349 : vector<8x64xf32>
    %351 = vector.extract_strided_slice %348 {offsets = [0, 0], sizes = [8, 64], strides = [1, 1]} : vector<8x256xf32> to vector<8x64xf32>
    %352 = vector.extract_strided_slice %348 {offsets = [0, 64], sizes = [8, 64], strides = [1, 1]} : vector<8x256xf32> to vector<8x64xf32>
    %353 = vector.extract_strided_slice %348 {offsets = [0, 192], sizes = [8, 64], strides = [1, 1]} : vector<8x256xf32> to vector<8x64xf32>
    %354 = arith.mulf %352, %336 : vector<8x64xf32>
    %355 = arith.mulf %351, %350 : vector<8x64xf32>
    %356 = arith.addf %354, %355 : vector<8x64xf32>
    %357 = math.tanh %356 : vector<8x64xf32>
    %358 = arith.mulf %353, %357 : vector<8x64xf32>
    %359 = vector.extract_strided_slice %212 {offsets = [56, 0], sizes = [8, 256], strides = [1, 1]} : vector<64x256xf32> to vector<8x256xf32>
    %360 = vector.extract_strided_slice %214 {offsets = [0, 0], sizes = [8, 256], strides = [1, 1]} : vector<64x256xf32> to vector<8x256xf32>
    %361 = arith.addf %359, %360 : vector<8x256xf32>
    %cst_79 = arith.constant dense<0.000000e+00> : vector<8x256xf32>
    %362 = tpu.matmul %358, %215, %cst_79 {dimension_numbers = #tpu.dot_dimension_numbers<[1], [0], [0], [1], [0, 0, 1, 1], [], []>} : vector<8x64xf32>, vector<64x256xf32>, vector<8x256xf32> -> vector<8x256xf32>
    %363 = arith.addf %361, %362 : vector<8x256xf32>
    %364 = arith.negf %363 : vector<8x256xf32>
    %365 = math.exp %364 : vector<8x256xf32>
    %cst_80 = arith.constant 1.000000e+00 : f32
    %366 = vector.broadcast %cst_80 : f32 to vector<8x256xf32>
    %367 = arith.addf %366, %365 : vector<8x256xf32>
    %368 = arith.divf %366, %367 : vector<8x256xf32>
    %369 = vector.extract_strided_slice %363 {offsets = [0, 128], sizes = [8, 64], strides = [1, 1]} : vector<8x256xf32> to vector<8x64xf32>
    %370 = math.tanh %369 : vector<8x64xf32>
    %371 = vector.extract_strided_slice %368 {offsets = [0, 0], sizes = [8, 64], strides = [1, 1]} : vector<8x256xf32> to vector<8x64xf32>
    %372 = vector.extract_strided_slice %368 {offsets = [0, 64], sizes = [8, 64], strides = [1, 1]} : vector<8x256xf32> to vector<8x64xf32>
    %373 = vector.extract_strided_slice %368 {offsets = [0, 192], sizes = [8, 64], strides = [1, 1]} : vector<8x256xf32> to vector<8x64xf32>
    %374 = arith.mulf %372, %356 : vector<8x64xf32>
    %375 = arith.mulf %371, %370 : vector<8x64xf32>
    %376 = arith.addf %374, %375 : vector<8x64xf32>
    %377 = math.tanh %376 : vector<8x64xf32>
    %378 = arith.mulf %373, %377 : vector<8x64xf32>
    %379 = vector.extract_strided_slice %378 {offsets = [0, 0], sizes = [8, 32], strides = [1, 1]} : vector<8x64xf32> to vector<8x32xf32>
    %380 = tpu.concatenate %379, %238 in 1 : vector<8x32xf32>, vector<8x32xf32> -> vector<8x64xf32>
    %c0_81 = arith.constant 0 : index
    %c0_82 = arith.constant 0 : index
    %381 = vector.load %arg10[%c0_81, %c0_82] : memref<1x64xf32, #tpu.memory_space<vmem>>, vector<1x64xf32>
    %382 = vector.broadcast %381 : vector<1x64xf32> to vector<8x64xf32>
    %383 = arith.mulf %380, %382 : vector<8x64xf32>
    %cst_83 = arith.constant dense<0.000000e+00> : vector<8xf32>
    %384 = vector.multi_reduction <add>, %383, %cst_83 [1] : vector<8x64xf32> to vector<8xf32>
    %385 = vector.shape_cast %384 : vector<8xf32> to vector<8x1xf32>
    %c0_84 = arith.constant 0 : index
    %c0_85 = arith.constant 0 : index
    %386 = vector.load %arg11[%c0_84, %c0_85] : memref<1x1xf32, #tpu.memory_space<vmem>>, vector<1x1xf32>
    %387 = vector.broadcast %386 : vector<1x1xf32> to vector<8x1xf32>
    %388 = arith.addf %385, %387 : vector<8x1xf32>
    %c0_86 = arith.constant 0 : index
    %c0_87 = arith.constant 0 : index
    %389 = vector.load %arg12[%c0_86, %c0_87] : memref<8x1xf32, #tpu.memory_space<vmem>>, vector<8x1xf32>
    tpu.vector_store %arg12[%c0_86, %c0_87], %388 {strides = array<i32>} : memref<8x1xf32, #tpu.memory_space<vmem>>, vector<8x1xf32>,
    return
  }
  func.func @transform_0(%arg0: i32) -> (i32, i32) {
    %c0_i32 = arith.constant 0 : i32
    %c0_i32_0 = arith.constant 0 : i32
    %c0_i32_1 = arith.constant 0 : i32
    return %c0_i32, %c0_i32_0 : i32, i32
  }
  func.func @transform_1(%arg0: i32) -> (i32, i32) {
    %c0_i32 = arith.constant 0 : i32
    %c0_i32_0 = arith.constant 0 : i32
    %c0_i32_1 = arith.constant 0 : i32
    return %c0_i32, %c0_i32_0 : i32, i32
  }
  func.func @transform_2(%arg0: i32) -> (i32, i32) {
    %c0_i32 = arith.constant 0 : i32
    %c0_i32_0 = arith.constant 0 : i32
    %c0_i32_1 = arith.constant 0 : i32
    return %c0_i32, %c0_i32_0 : i32, i32
  }
  func.func @transform_3(%arg0: i32) -> (i32, i32) {
    %c0_i32 = arith.constant 0 : i32
    %c0_i32_0 = arith.constant 0 : i32
    %c0_i32_1 = arith.constant 0 : i32
    return %c0_i32, %c0_i32_0 : i32, i32
  }
  func.func @transform_4(%arg0: i32) -> (i32, i32) {
    %c0_i32 = arith.constant 0 : i32
    %c0_i32_0 = arith.constant 0 : i32
    %c0_i32_1 = arith.constant 0 : i32
    return %c0_i32, %c0_i32_0 : i32, i32
  }
  func.func @transform_5(%arg0: i32) -> (i32, i32) {
    %c0_i32 = arith.constant 0 : i32
    %c0_i32_0 = arith.constant 0 : i32
    %c0_i32_1 = arith.constant 0 : i32
    return %c0_i32, %c0_i32_0 : i32, i32
  }
  func.func @transform_6(%arg0: i32) -> (i32, i32) {
    %c0_i32 = arith.constant 0 : i32
    %c0_i32_0 = arith.constant 0 : i32
    %c0_i32_1 = arith.constant 0 : i32
    return %c0_i32, %c0_i32_0 : i32, i32
  }
  func.func @transform_7(%arg0: i32) -> (i32, i32) {
    %c0_i32 = arith.constant 0 : i32
    %c0_i32_0 = arith.constant 0 : i32
    %c0_i32_1 = arith.constant 0 : i32
    return %c0_i32, %c0_i32_0 : i32, i32
  }
  func.func @transform_8(%arg0: i32) -> (i32, i32) {
    %c0_i32 = arith.constant 0 : i32
    %c0_i32_0 = arith.constant 0 : i32
    %c0_i32_1 = arith.constant 0 : i32
    return %c0_i32, %c0_i32_0 : i32, i32
  }
  func.func @transform_9(%arg0: i32) -> (i32, i32) {
    %c0_i32 = arith.constant 0 : i32
    %c0_i32_0 = arith.constant 0 : i32
    %c0_i32_1 = arith.constant 0 : i32
    return %c0_i32, %c0_i32_0 : i32, i32
  }
  func.func @transform_10(%arg0: i32) -> (i32, i32) {
    %c0_i32 = arith.constant 0 : i32
    %c0_i32_0 = arith.constant 0 : i32
    %c0_i32_1 = arith.constant 0 : i32
    return %c0_i32, %c0_i32_0 : i32, i32
  }
  func.func @transform_11(%arg0: i32) -> (i32, i32) {
    %c0_i32 = arith.constant 0 : i32
    %c0_i32_0 = arith.constant 0 : i32
    %c0_i32_1 = arith.constant 0 : i32
    return %c0_i32, %c0_i32_0 : i32, i32
  }
}

</mosaic_0001>

<bundles_post_ra>
// kernel: tpu_custom_call.1
= control target key start
LH: loop header
LB: loop body
LE: loop exit
PB: predicated region body
PF: predicated region fallthrough
CT: control target
= control target key end

     0   :  { %s3551_s0 = inlined_call_operand.vmem [shape: f32[64,1], index: 0, kind: input, shape index: {}]   ;;  %s3552_s1 = inlined_call_operand.vmem [shape: f32[1,256], index: 1, kind: input, shape index: {}]   ;;  %s3553_s2 = inlined_call_operand.vmem [shape: f32[1,256], index: 2, kind: input, shape index: {}]   ;;  %s3554_s3 = inlined_call_operand.hbm [shape: f32[64,256], index: 3, kind: input, shape index: {}]   ;;  %s3555_s4 = inlined_call_operand.vmem [shape: f32[1,256], index: 4, kind: input, shape index: {}]   ;;  %s3556_s5 = inlined_call_operand.hbm [shape: f32[64,256], index: 5, kind: input, shape index: {}]   ;;  %s3557_s6 = inlined_call_operand.hbm [shape: f32[64,256], index: 6, kind: input, shape index: {}]   ;;  %s3558_s7 = inlined_call_operand.hbm [shape: f32[64,256], index: 7, kind: input, shape index: {}]   ;;  %s3559_s8 = inlined_call_operand.vmem [shape: f32[1,256], index: 8, kind: input, shape index: {}]   ;;  %s3560_s9 = inlined_call_operand.vmem [shape: f32[1,64], index: 9, kind: input, shape index: {}]   ;;  %s3561_s10 = inlined_call_operand.<no memory space> [shape: f32[1,1], index: 10, kind: input, shape index: {}]   ;;  %s3562_s11 = inlined_call_operand.vmem [shape: f32[8,1], index: 11, kind: output, shape index: {}]  }
   0x1   :  { %v16_v0 = vstv %s3561_s10 }
   0x2   :  { %17 = vst [vmem:[#allocation3] sm:$0x1] %v16_v0 }
   0x3   :  { %18 = vsyncpa [#allocation5], 0 }
   0x4   :  { %19 = vsyncpa [#allocation7], 0 }
   0x5   :  { %20 = vsyncpa [#allocation10], 0  ;;  %s2947_s19 = smov [#allocation6]   ;;  %s2948_s21 = smov [#allocation4]  }
   0x6   :  { %s46_s20 = sshll.u32 %s2947_s19, 4  ;;  %s32_s22 = sshll.u32 %s2948_s21, 4  ;;  %s47_s20 = int_to_ptr.vmem [resolvable:$true] %s46_s20  ;;  %s3019_s22 = int_to_ptr.vmem [resolvable:$true] %s32_s22 }
   0x7   :  { %s2853_s25 = scalar_lea.hbm %s3556_s5, 2048 }
   0x8   :  { %p2854_p0 = scmp.ne.s32.totalorder %s3556_s5, %s2853_s25  ;;  %p2857_p1 = scmp.lt.u32.totalorder %s2853_s25, %s3556_s5 }
   0xa   :  { %p2859_p2 = pnand %p2857_p1, %p2854_p0 }
   0xc   :  { %2862 = shalt.err (!%p2859_p2)
}
   0xd   :  { %s2863_s29 = scalar_lea.vmem %s47_s20, 2048  ;;  %p2868_p4 = scmp.lt.s32.totalorder %s47_s20, %s47_s20 }
   0xe   :  { %p2864_p3 = scmp.ne.s32.totalorder %s47_s20, %s2863_s29  ;;  %p2869_p5 = scmp.lt.s32.totalorder %s2863_s29, %s2863_s29 }
  0x10   :  { %p2870_p6 = por %p2869_p5, %p2868_p4 }
  0x12   :  { %p2871_p7 = pnand %p2870_p6, %p2864_p3 }
  0x14   :  { %2874 = shalt.err (!%p2871_p7)
}
  0x15   :  { %s2949_s30 = smov 256   ;;  %s2950_s12 = smov 16  }
  0x16   :  { %52 = dma.hbm_to_vmem [thread:$0]  %s3556_s5, 2048, %s47_s20, [#allocation7], %s2949_s30, %s2949_s30, %s2950_s12  }
  0x17   :  { %s2875_s17 = scalar_lea.hbm %s3554_s3, 2048 }
  0x18   :  { %p2876_p8 = scmp.ne.s32.totalorder %s3554_s3, %s2875_s17  ;;  %p2879_p9 = scmp.lt.u32.totalorder %s2875_s17, %s3554_s3 }
  0x1a   :  { %p2881_p10 = pnand %p2879_p9, %p2876_p8 }
  0x1c   :  { %2884 = shalt.err (!%p2881_p10)
}
  0x1d   :  { %s2885_s24 = scalar_lea.vmem %s3019_s22, 2048  ;;  %p2890_p12 = scmp.lt.s32.totalorder %s3019_s22, %s3019_s22 }
  0x1e   :  { %p2886_p11 = scmp.ne.s32.totalorder %s3019_s22, %s2885_s24  ;;  %p2891_p13 = scmp.lt.s32.totalorder %s2885_s24, %s2885_s24 }
  0x20   :  { %p2892_p0 = por %p2891_p13, %p2890_p12 }
  0x22   :  { %p2893_p1 = pnand %p2892_p0, %p2886_p11 }
  0x24   :  { %2896 = shalt.err (!%p2893_p1)
}
  0x25   :  { %38 = dma.hbm_to_vmem [thread:$0]  %s3554_s3, 2048, %s3019_s22, [#allocation5], %s2949_s30, %s2949_s30, %s2950_s12  }
  0x26   :  { %s2951_s25 = smov [#allocation8]   ;;  %s2952_s27 = smov [#allocation9]  }
  0x27   :  { %s58_s26 = sshll.u32 %s2951_s25, 4  ;;  %s70_s10 = sshll.u32 %s2952_s27, 4  ;;  %s59_s26 = int_to_ptr.vmem [resolvable:$true] %s58_s26  ;;  %s3056_s10 = int_to_ptr.vmem [resolvable:$true] %s70_s10 }
  0x28   :  { %s2897_s13 = scalar_lea.hbm %s3557_s6, 2048 }
  0x29   :  { %p2898_p2 = scmp.ne.s32.totalorder %s3557_s6, %s2897_s13  ;;  %p2901_p3 = scmp.lt.u32.totalorder %s2897_s13, %s3557_s6 }
  0x2b   :  { %p2903_p4 = pnand %p2901_p3, %p2898_p2 }
  0x2d   :  { %2906 = shalt.err (!%p2903_p4)
}
  0x2e   :  { %s2907_s3 = scalar_lea.vmem %s59_s26, 2048  ;;  %p2912_p6 = scmp.lt.s32.totalorder %s59_s26, %s59_s26 }
  0x2f   :  { %p2908_p5 = scmp.ne.s32.totalorder %s59_s26, %s2907_s3  ;;  %p2913_p7 = scmp.lt.s32.totalorder %s2907_s3, %s2907_s3 }
  0x31   :  { %p2914_p8 = por %p2913_p7, %p2912_p6 }
  0x33   :  { %p2915_p9 = pnand %p2914_p8, %p2908_p5 }
  0x35   :  { %2918 = shalt.err (!%p2915_p9)
}
  0x36   :  { %64 = dma.hbm_to_vmem [thread:$0]  %s3557_s6, 2048, %s59_s26, [#allocation7], %s2949_s30, %s2949_s30, %s2950_s12  }
  0x37   :  { %s2919_s23 = scalar_lea.hbm %s3558_s7, 2048 }
  0x38   :  { %p2920_p10 = scmp.ne.s32.totalorder %s3558_s7, %s2919_s23  ;;  %p2923_p11 = scmp.lt.u32.totalorder %s2919_s23, %s3558_s7 }
  0x3a   :  { %p2925_p12 = pnand %p2923_p11, %p2920_p10 }
  0x3c   :  { %2928 = shalt.err (!%p2925_p12)
}
  0x3d   :  { %s2929_s27 = scalar_lea.vmem %s3056_s10, 2048  ;;  %p2934_p0 = scmp.lt.s32.totalorder %s3056_s10, %s3056_s10 }
  0x3e   :  { %p2930_p13 = scmp.ne.s32.totalorder %s3056_s10, %s2929_s27  ;;  %p2935_p1 = scmp.lt.s32.totalorder %s2929_s27, %s2929_s27 }
  0x40   :  { %p2936_p2 = por %p2935_p1, %p2934_p0 }
  0x42   :  { %p2937_p3 = pnand %p2936_p2, %p2930_p13 }
  0x44   :  { %2940 = shalt.err (!%p2937_p3)
}
  0x45   :  { %76 = dma.hbm_to_vmem [thread:$0]  %s3558_s7, 2048, %s3056_s10, [#allocation10], %s2949_s30, %s2949_s30, %s2950_s12  }
  0x46   :  { %2941 = dma.done.wait [#allocation5], 2048  }
  0x47   :  { %2942 = vsyncadd [#allocation5], 4294965248 }
  0x48   :  { %2943 = dma.done.wait [#allocation7], 4096  }
  0x49   :  { %2944 = vsyncadd [#allocation7], 4294963200 }
  0x4a   :  { %2945 = dma.done.wait [#allocation10], 2048  }
  0x4b   :  { %2946 = vsyncadd [#allocation10], 4294965248  ;;  %v2953_v1 = vmov 0.0   ;;  %v2954_v2 = vmov 0   ;;  %v228_v3 = vld [vmem:[#allocation4 + $0x8] sm:$0xff]  ;;  %v230_v4 = vld [vmem:[#allocation4 + $0x18] sm:$0xff]  ;;  %v145_v30 = vlaneseq }
  0x4c   :  { %313 = vmatprep.mubr.f32.mxu1 %v2953_v1  ;;  %2659 = vset.pattern.permute.xlu0 %v2954_v2  ;;  %v227_v5 = vld [vmem:[#allocation4] sm:$0xff]  ;;  %v3095_v6 = vpack.c.bf16 %v230_v4, %v228_v3  ;;  %v229_v7 = vld [vmem:[#allocation4 + $0x10] sm:$0xff]  ;;  %v232_v8 = vld [vmem:[#allocation4 + $0x28] sm:$0xff]  ;;  %vm348_vm0 = vcmask 261120   ;;  %vm350_vm1 = vcmask 523520   ;;  %vm245_vm2 = vcmask 523264  }
  0x4d   :  { %2660 = vset.pattern.permute.xlu1 %v2954_v2  ;;  %525 = vmatprep.mubr.f32.mxu0 %v2953_v1  ;;  %v234_v9 = vld [vmem:[#allocation4 + $0x38] sm:$0xff]  ;;  %v3097_v10 = vpack.c.bf16 %v229_v7, %v227_v5  ;;  %v231_v12 = vld [vmem:[#allocation4 + $0x20] sm:$0xff]  ;;  %v233_v13 = vld [vmem:[#allocation4 + $0x30] sm:$0xff]  ;;  %v146_v31 = vshrl.u32 %v145_v30, 7  ;;  %vm2241_vm3 = vcmask 7168  }
  0x4e   :  { %v3099_v11 = vpack.c.bf16 %v234_v9, %v232_v8  ;;  %v236_v14 = vld [vmem:[#allocation4 + $0x48] sm:$0xff]  ;;  %2315 = vmatprep.subr.bf16.mxu1 %v3095_v6  ;;  %v238_v15 = vld [vmem:[#allocation4 + $0x58] sm:$0xff]  ;;  %2347 = vmatprep.subr.bf16.mxu0 %v3095_v6  ;;  %v3104_v16 = vpack.c.bf16 %v233_v13, %v231_v12  ;;  %v235_v18 = vld [vmem:[#allocation4 + $0x40] sm:$0xff] }
  0x4f   :  { %2317 = vmatpush1.bf16.msra.mxu1 %v3097_v10  ;;  %2349 = vmatpush1.bf16.msra.mxu0 %v3097_v10  ;;  %v3108_v17 = vpack.c.bf16 %v238_v15, %v236_v14  ;;  %v237_v19 = vld [vmem:[#allocation4 + $0x50] sm:$0xff]  ;;  %v95_v20 = vld [vmem:[%s3551_s0] sm:$0xff]  ;;  %v240_v21 = vld [vmem:[#allocation4 + $0x68] sm:$0xff]  ;;  %v3148_v32 = vsub.s32 0, %v146_v31  ;;  %v3150_v33 = vsub.s32 1, %v146_v31 }
  0x50   :  { %2319 = vmatprep.subr.bf16.mxu1 %v3099_v11  ;;  %2351 = vmatprep.subr.bf16.mxu0 %v3099_v11  ;;  %v242_v22 = vld [vmem:[#allocation4 + $0x78] sm:$0xff]  ;;  %v3118_v24 = vpack.c.bf16 %v237_v19, %v235_v18  ;;  %v239_v26 = vld [vmem:[#allocation4 + $0x60] sm:$0xff]  ;;  %v241_v27 = vld [vmem:[#allocation4 + $0x70] sm:$0xff] }
  0x51   :  { %106 = vperm.xlu0 %2659, %v95_v20   ;;  %v102_v23 = vld [vmem:[%s3551_s0 + $0x38] sm:$0xff]  ;;  %v3122_v25 = vpack.c.bf16 %v242_v22, %v240_v21  ;;  %v96_v28 = vld [vmem:[%s3551_s0 + $0x8] sm:$0xff]  ;;  %v3129_v29 = vpack.c.bf16 %v241_v27, %v239_v26  ;;  %v103_v34 = vld [vmem:[%s3552_s1] sm:$0x3]  ;;  %s2955_s1 = smov 64  }
  0x52   :  { %v199_v35 = vld [vmem:[%s3553_s2] sm:$0x3]  ;;  %v3162_v38 = vrot.slane %v103_v34, %v3148_v32  ;;  %v3165_v39 = vrot.slane %v103_v34, %v3150_v33  ;;  %v101_v22 = vld [vmem:[%s3551_s0 + $0x30] sm:$0xff] }
  0x53   :  { %2321 = vmatpush1.bf16.msra.mxu1 %v3104_v16  ;;  %2353 = vmatpush1.bf16.msra.mxu0 %v3104_v16  ;;  %v171_v37 = vld [vmem:[%s3555_s4] sm:$0x3]  ;;  %v3168_v40 = vrot.slane %v199_v35, %v3148_v32  ;;  %v3171_v41 = vrot.slane %v199_v35, %v3150_v33 }
  0x54   :  { %2323 = vmatprep.subr.bf16.mxu1 %v3108_v17  ;;  %2355 = vmatprep.subr.bf16.mxu0 %v3108_v17  ;;  %v3174_v42 = vrot.slane %v171_v37, %v3148_v32  ;;  %v3177_v43 = vrot.slane %v171_v37, %v3150_v33 }
  0x55   :  { %141 = vperm.xlu0 %2659, %v102_v23  }
  0x57   :  { %2325 = vmatpush1.bf16.msra.mxu1 %v3118_v24  ;;  %2357 = vmatpush1.bf16.msra.mxu0 %v3118_v24 }
  0x58   :  { %2327 = vmatprep.subr.bf16.mxu1 %v3122_v25  ;;  %2359 = vmatprep.subr.bf16.mxu0 %v3122_v25 }
  0x59   :  { %111 = vperm.xlu0 %2659, %v96_v28  }
  0x5b   :  { %2329 = vmatpush1.bf16.msra.mxu1 %v3129_v29  ;;  %2361 = vmatpush1.bf16.msra.mxu0 %v3129_v29 }
  0x5c   :  { %2331 = vmatprep.subr.bf16.mxu1 %v3095_v6  ;;  %2379 = vmatprep.subr.bf16.mxu0 %v3095_v6 }
  0x5e   :  { %314 = vmatmul.mubr.f32.vlgmr.msra.gmra.mrb[0].mxu1 %v2953_v1 }
  0x5f   :  { %2333 = vmatpush1.bf16.msra.mxu1 %v3097_v10  ;;  %420 = vmatprep.mubr.f32.mxu1 %v2953_v1 }
  0x60   :  { %2335 = vmatprep.subr.bf16.mxu1 %v3099_v11 }
  0x63   :  { %2337 = vmatpush1.bf16.msra.mxu1 %v3104_v16 }
  0x64   :  { %2339 = vmatprep.subr.bf16.mxu1 %v3108_v17 }
  0x67   :  { %2341 = vmatpush1.bf16.msra.mxu1 %v3118_v24 }
  0x68   :  { %2343 = vmatprep.subr.bf16.mxu1 %v3122_v25 }
  0x6b   :  { %2345 = vmatpush1.bf16.msra.mxu1 %v3129_v29 }
  0x6c   :  { %2363 = vmatprep.subr.bf16.mxu1 %v3095_v6 }
  0xd0   :  { %v107_v36 = vpop.permute.xlu0 %106 }
  0xd1   :  { %v211_v47 = vmul.f32 %v3168_v40, %v107_v36  ;;  %v212_v48 = vmul.f32 %v3171_v41, %v107_v36  ;;  %v155_v53 = vmul.f32 %v3162_v38, %v107_v36  ;;  %v156_v60 = vmul.f32 %v3165_v39, %v107_v36 }
  0xd3   :  { %v183_v54 = vadd.f32 %v3174_v42, %v155_v53  ;;  %v184_v62 = vadd.f32 %v3177_v43, %v156_v60 }
  0xd4   :  { %v142_v44 = vpop.permute.xlu0 %141 }
  0xd5   :  { %v169_v45 = vmul.f32 %v3162_v38, %v142_v44  ;;  %v170_v46 = vmul.f32 %v3165_v39, %v142_v44  ;;  %v225_v55 = vmul.f32 %v3168_v40, %v142_v44  ;;  %v226_v63 = vmul.f32 %v3171_v41, %v142_v44 }
  0xd7   :  { %v197_v49 = vadd.f32 %v3174_v42, %v169_v45  ;;  %v198_v50 = vadd.f32 %v3177_v43, %v170_v46  ;;  %v243_v56 = vadd.f32 %v225_v55, %v183_v54  ;;  %v244_v0 = vadd.f32 %v226_v63, %v184_v62 }
  0xd8   :  { %v3212_v26 = vpop.permute.xlu0 %111 }
  0xd9   :  { %v3185_v51 = vadd.f32 %v211_v47, %v197_v49  ;;  %v3187_v52 = vadd.f32 %v212_v48, %v198_v50  ;;  %v157_v28 = vmul.f32 %v3162_v38, %v3212_v26  ;;  %v158_v45 = vmul.f32 %v3165_v39, %v3212_v26 }
  0xdb   :  { %v185_v31 = vadd.f32 %v3174_v42, %v157_v28  ;;  %v186_v47 = vadd.f32 %v3177_v43, %v158_v45 }
 0x131   :  { %v315_v57 = vpop.f32.mrb[0].mxu1 }
 0x132   :  { %v320_v58 = vadd.f32 %v315_v57, %v243_v56  ;;  %v317_v59 = vpop.f32.mrb[1].mxu1  ;;  %v97_v57 = vld [vmem:[%s3551_s0 + $0x10] sm:$0xff] }
 0x133   :  { %v321_v2 = vadd.f32 %v317_v59, %v244_v0 }
 0x134   :  { %v2250_v61 = vmul.f32 -1.442695, %v320_v58 }
 0x135   :  { %v2251_v9 = vmul.f32 -1.442695, %v321_v2 }
 0x136   :  { %2661 = vpow2.f32 %v2250_v61 }
 0x137   :  { %2663 = vtanh.f32 %v321_v2 }
 0x140   :  { %v2662_v3 = vpop.eup %2661 }
 0x141   :  { %v328_v4 = vadd.f32 1.0, %v2662_v3  ;;  %v2664_v5 = vpop.eup %2663 }
 0x143   :  { %2665 = vrcp.f32 %v328_v4  ;;  %v100_v4 = vld [vmem:[%s3551_s0 + $0x28] sm:$0xff] }
 0x144   :  { %2667 = vpow2.f32 %v2251_v9 }
 0x14d   :  { %v2666_v7 = vpop.eup %2665 }
 0x14e   :  { %v336_v8 = vmul.f32 %v2666_v7, %v2664_v5  ;;  %v2668_v12 = vpop.eup %2667  ;;  %v335_v14 = vmul.f32 0.0, %v2666_v7 }
 0x14f   :  { %v329_v13 = vadd.f32 1.0, %v2668_v12 }
 0x150   :  { %338 = vrot.lane.b32.xlu1 %v336_v8, %s2955_s1 }
 0x151   :  { %2669 = vrcp.f32 %v329_v13 }
 0x15b   :  { %v2670_v19 = vpop.eup %2669 }
 0x1c2   :  { %v339_v15 = vpop.permute.xlu1 %338 }
 0x1c3   :  { %v341_v18 = vadd.f32 %v339_v15, %v335_v14 }
 0x1c5   :  { %2671 = vtanh.f32 %v341_v18 }
 0x1cf   :  { %v2672_v20 = vpop.eup %2671 }
 0x1d0   :  { %v343_v21 = vmul.f32 %v2672_v20, %v2670_v19 }
 0x1d2   :  { %345 = vrot.lane.b32.xlu1 %v343_v21, %s2955_s1 }
 0x1d6   :  { %136 = vperm.xlu1 %2660, %v101_v22  }
 0x244   :  { %v346_v23 = vpop.permute.xlu1 %345 }
 0x245   :  { %349 = vst.msk [vmem:[#allocation2] sm:$0xff] %vm348_vm0, %v346_v23  ;;  %2252 = vmatmul.mubr.msk.f32.vlgmr.msra.gmra.mrb[2].mxu1 %vm245_vm2, %v346_v23 }
 0x246   :  { %351 = vst.msk [vmem:[#allocation2 + $0x38] sm:$0xff] %vm350_vm1, %v346_v23  ;;  %2365 = vmatpush1.bf16.msra.mxu1 %v3097_v10  ;;  %630 = vmatprep.mubr.f32.mxu1 %v2953_v1 }
 0x247   :  { %2367 = vmatprep.subr.bf16.mxu1 %v3099_v11 }
 0x24a   :  { %2369 = vmatpush1.bf16.msra.mxu1 %v3104_v16 }
 0x24b   :  { %2371 = vmatprep.subr.bf16.mxu1 %v3108_v17 }
 0x24e   :  { %2373 = vmatpush1.bf16.msra.mxu1 %v3118_v24 }
 0x24f   :  { %2375 = vmatprep.subr.bf16.mxu1 %v3122_v25 }
 0x252   :  { %2377 = vmatpush1.bf16.msra.mxu1 %v3129_v29 }
 0x253   :  { %2395 = vmatprep.subr.bf16.mxu1 %v3095_v6 }
 0x255   :  { %v3214_v27 = vpop.permute.xlu1 %136 }
 0x256   :  { %v223_v30 = vmul.f32 %v3168_v40, %v3214_v27  ;;  %v224_v46 = vmul.f32 %v3171_v41, %v3214_v27 }
 0x258   :  { %v352_v34 = vadd.f32 %v223_v30, %v185_v31  ;;  %v353_v48 = vadd.f32 %v224_v46, %v186_v47 }
 0x318   :  { %v422_v35 = vpop.f32.mrb[2].mxu1 }
 0x319   :  { %v427_v36 = vadd.f32 %v422_v35, %v352_v34  ;;  %v424_v37 = vpop.f32.mrb[3].mxu1 }
 0x31a   :  { %v428_v49 = vadd.f32 %v424_v37, %v353_v48 }
 0x31b   :  { %v2253_v44 = vmul.f32 -1.442695, %v427_v36 }
 0x31c   :  { %v2254_v58 = vmul.f32 -1.442695, %v428_v49 }
 0x31d   :  { %2673 = vpow2.f32 %v2253_v44  ;;  %v98_v44 = vld [vmem:[%s3551_s0 + $0x18] sm:$0xff] }
 0x31e   :  { %2675 = vtanh.f32 %v428_v49 }
 0x327   :  { %v2674_v50 = vpop.eup %2673 }
 0x328   :  { %v435_v53 = vadd.f32 1.0, %v2674_v50  ;;  %v2676_v54 = vpop.eup %2675 }
 0x32a   :  { %2677 = vrcp.f32 %v435_v53 }
 0x32b   :  { %2679 = vpow2.f32 %v2254_v58 }
 0x334   :  { %v2678_v55 = vpop.eup %2677 }
 0x335   :  { %v443_v56 = vmul.f32 %v2678_v55, %v2676_v54  ;;  %v2680_v59 = vpop.eup %2679  ;;  %v442_v61 = vmul.f32 %v2678_v55, %v341_v18 }
 0x336   :  { %v436_v60 = vadd.f32 1.0, %v2680_v59 }
 0x337   :  { %445 = vrot.lane.b32.xlu0 %v443_v56, %s2955_s1  ;;  %v99_v56 = vld [vmem:[%s3551_s0 + $0x20] sm:$0xff] }
 0x338   :  { %2681 = vrcp.f32 %v436_v60 }
 0x33b   :  { %116 = vperm.xlu0 %2659, %v97_v57  }
 0x342   :  { %v2682_v0 = vpop.eup %2681 }
 0x3a9   :  { %v446_v62 = vpop.permute.xlu0 %445 }
 0x3aa   :  { %v448_v63 = vadd.f32 %v446_v62, %v442_v61 }
 0x3ac   :  { %2683 = vtanh.f32 %v448_v63 }
 0x3b6   :  { %v2684_v2 = vpop.eup %2683 }
 0x3b7   :  { %v450_v3 = vmul.f32 %v2684_v2, %v2682_v0 }
 0x3b9   :  { %452 = vrot.lane.b32.xlu1 %v450_v3, %s2955_s1 }
 0x3ba   :  { %v3246_v7 = vpop.permute.xlu0 %116 }
 0x3bb   :  { %v159_v9 = vmul.f32 %v3162_v38, %v3246_v7  ;;  %v160_v21 = vmul.f32 %v3165_v39, %v3246_v7 }
 0x3bd   :  { %131 = vperm.xlu1 %2660, %v100_v4   ;;  %v187_v13 = vadd.f32 %v3174_v42, %v159_v9  ;;  %v188_v23 = vadd.f32 %v3177_v43, %v160_v21 }
 0x42b   :  { %v453_v5 = vpop.permute.xlu1 %452 }
 0x42c   :  { %455 = vst.msk [vmem:[#allocation2 + $0x8] sm:$0xff] %vm348_vm0, %v453_v5  ;;  %2255 = vmatmul.mubr.msk.f32.vlgmr.msra.gmra.mrb[0].mxu0 %vm245_vm2, %v453_v5 }
 0x42d   :  { %456 = vst.msk [vmem:[#allocation2 + $0x30] sm:$0xff] %vm350_vm1, %v453_v5  ;;  %2381 = vmatpush1.bf16.msra.mxu0 %v3097_v10  ;;  %735 = vmatprep.mubr.f32.mxu0 %v2953_v1 }
 0x42e   :  { %2383 = vmatprep.subr.bf16.mxu0 %v3099_v11 }
 0x431   :  { %2385 = vmatpush1.bf16.msra.mxu0 %v3104_v16 }
 0x432   :  { %2387 = vmatprep.subr.bf16.mxu0 %v3108_v17 }
 0x435   :  { %2389 = vmatpush1.bf16.msra.mxu0 %v3118_v24 }
 0x436   :  { %2391 = vmatprep.subr.bf16.mxu0 %v3122_v25 }
 0x439   :  { %2393 = vmatpush1.bf16.msra.mxu0 %v3129_v29 }
 0x43a   :  { %2411 = vmatprep.subr.bf16.mxu0 %v3095_v6 }
 0x43c   :  { %v3248_v8 = vpop.permute.xlu1 %131 }
 0x43d   :  { %v221_v12 = vmul.f32 %v3168_v40, %v3248_v8  ;;  %v222_v22 = vmul.f32 %v3171_v41, %v3248_v8 }
 0x43f   :  { %v457_v14 = vadd.f32 %v221_v12, %v187_v13  ;;  %v458_v28 = vadd.f32 %v222_v22, %v188_v23 }
 0x4ff   :  { %v527_v15 = vpop.f32.mrb[0].mxu0 }
 0x500   :  { %v532_v18 = vadd.f32 %v527_v15, %v457_v14  ;;  %v529_v19 = vpop.f32.mrb[1].mxu0 }
 0x501   :  { %v533_v30 = vadd.f32 %v529_v19, %v458_v28 }
 0x502   :  { %v2256_v20 = vmul.f32 -1.442695, %v532_v18 }
 0x503   :  { %v2257_v45 = vmul.f32 -1.442695, %v533_v30 }
 0x504   :  { %2685 = vpow2.f32 %v2256_v20 }
 0x505   :  { %2687 = vtanh.f32 %v533_v30 }
 0x50e   :  { %v2686_v31 = vpop.eup %2685 }
 0x50f   :  { %v540_v34 = vadd.f32 1.0, %v2686_v31  ;;  %v2688_v35 = vpop.eup %2687 }
 0x511   :  { %2689 = vrcp.f32 %v540_v34 }
 0x512   :  { %2691 = vpow2.f32 %v2257_v45 }
 0x51b   :  { %v2690_v36 = vpop.eup %2689 }
 0x51c   :  { %v548_v37 = vmul.f32 %v2690_v36, %v2688_v35  ;;  %v2692_v46 = vpop.eup %2691  ;;  %v547_v48 = vmul.f32 %v2690_v36, %v448_v63 }
 0x51d   :  { %v541_v47 = vadd.f32 1.0, %v2692_v46 }
 0x51e   :  { %550 = vrot.lane.b32.xlu0 %v548_v37, %s2955_s1 }
 0x51f   :  { %2693 = vrcp.f32 %v541_v47 }
 0x522   :  { %121 = vperm.xlu0 %2659, %v98_v44  }
 0x529   :  { %v2694_v53 = vpop.eup %2693 }
 0x590   :  { %v551_v49 = vpop.permute.xlu0 %550 }
 0x591   :  { %v553_v50 = vadd.f32 %v551_v49, %v547_v48 }
 0x593   :  { %2695 = vtanh.f32 %v553_v50 }
 0x59d   :  { %v2696_v54 = vpop.eup %2695 }
 0x59e   :  { %v555_v55 = vmul.f32 %v2696_v54, %v2694_v53 }
 0x5a0   :  { %557 = vrot.lane.b32.xlu1 %v555_v55, %s2955_s1 }
 0x5a1   :  { %v122_v58 = vpop.permute.xlu0 %121 }
 0x5a2   :  { %v161_v60 = vmul.f32 %v3162_v38, %v122_v58  ;;  %v162_v5 = vmul.f32 %v3165_v39, %v122_v58  ;;  %v217_v46 = vmul.f32 %v3168_v40, %v122_v58 }
 0x5a4   :  { %126 = vperm.xlu1 %2660, %v99_v56   ;;  %v189_v62 = vadd.f32 %v3174_v42, %v161_v60  ;;  %v218_v56 = vmul.f32 %v3171_v41, %v122_v58 }
 0x612   :  { %v558_v57 = vpop.permute.xlu1 %557 }
 0x613   :  { %560 = vst.msk [vmem:[#allocation2 + $0x10] sm:$0xff] %vm348_vm0, %v558_v57  ;;  %2258 = vmatmul.mubr.msk.f32.vlgmr.msra.gmra.mrb[4].mxu1 %vm245_vm2, %v558_v57 }
 0x614   :  { %561 = vst.msk [vmem:[#allocation2 + $0x28] sm:$0xff] %vm350_vm1, %v558_v57  ;;  %2397 = vmatpush1.bf16.msra.mxu1 %v3097_v10  ;;  %840 = vmatprep.mubr.f32.mxu1 %v2953_v1 }
 0x615   :  { %2399 = vmatprep.subr.bf16.mxu1 %v3099_v11 }
 0x618   :  { %2401 = vmatpush1.bf16.msra.mxu1 %v3104_v16 }
 0x619   :  { %2403 = vmatprep.subr.bf16.mxu1 %v3108_v17 }
 0x61c   :  { %2405 = vmatpush1.bf16.msra.mxu1 %v3118_v24 }
 0x61d   :  { %2407 = vmatprep.subr.bf16.mxu1 %v3122_v25 }
 0x620   :  { %2409 = vmatpush1.bf16.msra.mxu1 %v3129_v29 }
 0x621   :  { %2427 = vmatprep.subr.bf16.mxu1 %v3095_v6  ;;  %v190_v6 = vadd.f32 %v3177_v43, %v162_v5 }
 0x623   :  { %v127_v59 = vpop.permute.xlu1 %126 }
 0x624   :  { %v219_v61 = vmul.f32 %v3168_v40, %v127_v59  ;;  %v220_v9 = vmul.f32 %v3171_v41, %v127_v59  ;;  %v163_v44 = vmul.f32 %v3162_v38, %v127_v59  ;;  %v164_v53 = vmul.f32 %v3165_v39, %v127_v59 }
 0x626   :  { %v562_v63 = vadd.f32 %v219_v61, %v189_v62  ;;  %v563_v12 = vadd.f32 %v220_v9, %v190_v6  ;;  %v191_v45 = vadd.f32 %v3174_v42, %v163_v44  ;;  %v192_v55 = vadd.f32 %v3177_v43, %v164_v53 }
 0x627   :  { %v213_v53 = vmul.f32 %v3168_v40, %v3212_v26 }
 0x628   :  { %v667_v47 = vadd.f32 %v217_v46, %v191_v45  ;;  %v668_v57 = vadd.f32 %v218_v56, %v192_v55 }
 0x6e6   :  { %v632_v0 = vpop.f32.mrb[4].mxu1 }
 0x6e7   :  { %v637_v2 = vadd.f32 %v632_v0, %v562_v63  ;;  %v634_v3 = vpop.f32.mrb[5].mxu1 }
 0x6e8   :  { %v638_v13 = vadd.f32 %v634_v3, %v563_v12 }
 0x6e9   :  { %v2259_v4 = vmul.f32 -1.442695, %v637_v2 }
 0x6ea   :  { %v2260_v21 = vmul.f32 -1.442695, %v638_v13 }
 0x6eb   :  { %2697 = vpow2.f32 %v2259_v4 }
 0x6ec   :  { %2699 = vtanh.f32 %v638_v13 }
 0x6f5   :  { %v2698_v14 = vpop.eup %2697 }
 0x6f6   :  { %v645_v15 = vadd.f32 1.0, %v2698_v14  ;;  %v2700_v18 = vpop.eup %2699 }
 0x6f8   :  { %2701 = vrcp.f32 %v645_v15  ;;  %v165_v15 = vmul.f32 %v3162_v38, %v3248_v8 }
 0x6f9   :  { %2703 = vpow2.f32 %v2260_v21 }
 0x702   :  { %v2702_v19 = vpop.eup %2701 }
 0x703   :  { %v653_v20 = vmul.f32 %v2702_v19, %v2700_v18  ;;  %v2704_v22 = vpop.eup %2703  ;;  %v652_v28 = vmul.f32 %v2702_v19, %v553_v50  ;;  %v193_v18 = vadd.f32 %v3174_v42, %v165_v15 }
 0x704   :  { %v646_v23 = vadd.f32 1.0, %v2704_v22 }
 0x705   :  { %655 = vrot.lane.b32.xlu0 %v653_v20, %s2955_s1 }
 0x706   :  { %2705 = vrcp.f32 %v646_v23 }
 0x710   :  { %v2706_v34 = vpop.eup %2705 }
 0x777   :  { %v656_v30 = vpop.permute.xlu0 %655 }
 0x778   :  { %v658_v31 = vadd.f32 %v656_v30, %v652_v28 }
 0x77a   :  { %2707 = vtanh.f32 %v658_v31 }
 0x784   :  { %v2708_v35 = vpop.eup %2707 }
 0x785   :  { %v660_v36 = vmul.f32 %v2708_v35, %v2706_v34 }
 0x787   :  { %662 = vrot.lane.b32.xlu1 %v660_v36, %s2955_s1 }
 0x7f9   :  { %v663_v37 = vpop.permute.xlu1 %662 }
 0x7fa   :  { %665 = vst.msk [vmem:[#allocation2 + $0x18] sm:$0xff] %vm348_vm0, %v663_v37  ;;  %2261 = vmatmul.mubr.msk.f32.vlgmr.msra.gmra.mrb[2].mxu0 %vm245_vm2, %v663_v37 }
 0x7fb   :  { %666 = vst.msk [vmem:[#allocation2 + $0x20] sm:$0xff] %vm350_vm1, %v663_v37  ;;  %2413 = vmatpush1.bf16.msra.mxu0 %v3097_v10  ;;  %945 = vmatprep.mubr.f32.mxu0 %v2953_v1 }
 0x7fc   :  { %2415 = vmatprep.subr.bf16.mxu0 %v3099_v11 }
 0x7ff   :  { %2417 = vmatpush1.bf16.msra.mxu0 %v3104_v16 }
 0x800   :  { %2419 = vmatprep.subr.bf16.mxu0 %v3108_v17 }
 0x803   :  { %2421 = vmatpush1.bf16.msra.mxu0 %v3118_v24 }
 0x804   :  { %2423 = vmatprep.subr.bf16.mxu0 %v3122_v25 }
 0x807   :  { %2425 = vmatpush1.bf16.msra.mxu0 %v3129_v29 }
 0x8cd   :  { %v737_v48 = vpop.f32.mrb[2].mxu0 }
 0x8ce   :  { %v742_v49 = vadd.f32 %v737_v48, %v667_v47  ;;  %v739_v50 = vpop.f32.mrb[3].mxu0 }
 0x8cf   :  { %v743_v60 = vadd.f32 %v739_v50, %v668_v57 }
 0x8d0   :  { %v2262_v54 = vmul.f32 -1.442695, %v742_v49  ;;  %v167_v49 = vmul.f32 %v3162_v38, %v3214_v27 }
 0x8d1   :  { %v2263_v3 = vmul.f32 -1.442695, %v743_v60 }
 0x8d2   :  { %2709 = vpow2.f32 %v2262_v54  ;;  %v195_v50 = vadd.f32 %v3174_v42, %v167_v49 }
 0x8d3   :  { %2711 = vtanh.f32 %v743_v60  ;;  %v168_v60 = vmul.f32 %v3165_v39, %v3214_v27 }
 0x8d4   :  { %v877_v54 = vadd.f32 %v213_v53, %v195_v50  ;;  %v1108_v50 = vld [vmem:[#allocation6 + $0x68] sm:$0xff]  ;;  %v1110_v53 = vld [vmem:[#allocation6 + $0x78] sm:$0xff] }
 0x8dc   :  { %v2710_v61 = vpop.eup %2709 }
 0x8dd   :  { %v750_v62 = vadd.f32 1.0, %v2710_v61  ;;  %v2712_v63 = vpop.eup %2711 }
 0x8df   :  { %2713 = vrcp.f32 %v750_v62  ;;  %v196_v62 = vadd.f32 %v3177_v43, %v168_v60  ;;  %v1263_v60 = vld [vmem:[#allocation8 + $0x18] sm:$0xff] }
 0x8e0   :  { %2715 = vpow2.f32 %v2263_v3 }
 0x8e9   :  { %v2714_v0 = vpop.eup %2713 }
 0x8ea   :  { %v758_v2 = vmul.f32 %v2714_v0, %v2712_v63  ;;  %v2716_v59 = vpop.eup %2715  ;;  %v757_v5 = vmul.f32 %v2714_v0, %v658_v31  ;;  %v214_v63 = vmul.f32 %v3171_v41, %v3212_v26 }
 0x8eb   :  { %v751_v4 = vadd.f32 1.0, %v2716_v59 }
 0x8ec   :  { %760 = vrot.lane.b32.xlu0 %v758_v2, %s2955_s1  ;;  %v878_v38 = vadd.f32 %v214_v63, %v196_v62 }
 0x8ed   :  { %2717 = vrcp.f32 %v751_v4 }
 0x8f7   :  { %v2718_v58 = vpop.eup %2717 }
 0x95e   :  { %v761_v9 = vpop.permute.xlu0 %760 }
 0x95f   :  { %v763_v6 = vadd.f32 %v761_v9, %v757_v5 }
 0x961   :  { %2719 = vtanh.f32 %v763_v6 }
 0x96b   :  { %v2720_v12 = vpop.eup %2719 }
 0x96c   :  { %v765_v13 = vmul.f32 %v2720_v12, %v2718_v58 }
 0x96e   :  { %767 = vrot.lane.b32.xlu1 %v765_v13, %s2955_s1 }
 0x9e0   :  { %v768_v14 = vpop.permute.xlu1 %767 }
 0x9e1   :  { %770 = vst.msk [vmem:[#allocation2 + $0x20] sm:$0xff] %vm348_vm0, %v768_v14  ;;  %2264 = vmatmul.mubr.msk.f32.vlgmr.msra.gmra.mrb[6].mxu1 %vm245_vm2, %v768_v14 }
 0x9e2   :  { %771 = vst.msk [vmem:[#allocation2 + $0x18] sm:$0xff] %vm350_vm1, %v768_v14  ;;  %2429 = vmatpush1.bf16.msra.mxu1 %v3097_v10  ;;  %1050 = vmatprep.mubr.f32.mxu1 %v2953_v1  ;;  %v215_v10 = vmul.f32 %v3168_v40, %v3246_v7 }
 0x9e3   :  { %2431 = vmatprep.subr.bf16.mxu1 %v3099_v11 }
 0x9e4   :  { %v772_v19 = vadd.f32 %v215_v10, %v193_v18 }
 0x9e6   :  { %2433 = vmatpush1.bf16.msra.mxu1 %v3104_v16 }
 0x9e7   :  { %2435 = vmatprep.subr.bf16.mxu1 %v3108_v17  ;;  %v166_v17 = vmul.f32 %v3165_v39, %v3248_v8 }
 0x9ea   :  { %2437 = vmatpush1.bf16.msra.mxu1 %v3118_v24 }
 0x9eb   :  { %2439 = vmatprep.subr.bf16.mxu1 %v3122_v25  ;;  %v194_v25 = vadd.f32 %v3177_v43, %v166_v17  ;;  %v1096_v17 = vld [vmem:[#allocation6 + $0x8] sm:$0xff] }
 0x9ee   :  { %2441 = vmatpush1.bf16.msra.mxu1 %v3129_v29  ;;  %v216_v29 = vmul.f32 %v3171_v41, %v3246_v7 }
 0x9f0   :  { %v773_v21 = vadd.f32 %v216_v29, %v194_v25  ;;  %v1095_v25 = vld [vmem:[#allocation6] sm:$0xff] }
 0xab4   :  { %v842_v11 = vpop.f32.mrb[6].mxu1 }
 0xab5   :  { %v847_v20 = vadd.f32 %v842_v11, %v772_v19  ;;  %v844_v16 = vpop.f32.mrb[7].mxu1 }
 0xab6   :  { %v848_v22 = vadd.f32 %v844_v16, %v773_v21  ;;  %v1097_v21 = vld [vmem:[#allocation6 + $0x10] sm:$0xff] }
 0xab7   :  { %v2265_v24 = vmul.f32 -1.442695, %v847_v20 }
 0xab8   :  { %v2266_v35 = vmul.f32 -1.442695, %v848_v22 }
 0xab9   :  { %2721 = vpow2.f32 %v2265_v24  ;;  %v1098_v24 = vld [vmem:[#allocation6 + $0x18] sm:$0xff] }
 0xaba   :  { %2723 = vtanh.f32 %v848_v22  ;;  %v2442_v29 = vpack.c.bf16 %v1098_v24, %v1096_v17  ;;  %v1102_v22 = vld [vmem:[#allocation6 + $0x38] sm:$0xff]  ;;  %v1260_v17 = vld [vmem:[#allocation8] sm:$0xff]  ;;  %v1262_v24 = vld [vmem:[#allocation8 + $0x10] sm:$0xff] }
 0xabc   :  { %2443 = vmatprep.subr.bf16.mxu1 %v2442_v29  ;;  %v1267_v29 = vld [vmem:[#allocation8 + $0x38] sm:$0xff] }
 0xac3   :  { %v2722_v23 = vpop.eup %2721 }
 0xac4   :  { %v855_v28 = vadd.f32 1.0, %v2722_v23  ;;  %v2724_v30 = vpop.eup %2723  ;;  %v2444_v23 = vpack.c.bf16 %v1097_v21, %v1095_v25  ;;  %v1265_v25 = vld [vmem:[#allocation8 + $0x28] sm:$0xff]  ;;  %v2460_v21 = vpack.c.bf16 %v1262_v24, %v1260_v17 }
 0xac6   :  { %2725 = vrcp.f32 %v855_v28  ;;  %v1099_v28 = vld [vmem:[#allocation6 + $0x20] sm:$0xff] }
 0xac7   :  { %2727 = vpow2.f32 %v2266_v35 }
 0xad0   :  { %v2726_v31 = vpop.eup %2725 }
 0xad1   :  { %v863_v34 = vmul.f32 %v2726_v31, %v2724_v30  ;;  %v2728_v8 = vpop.eup %2727  ;;  %v862_v37 = vmul.f32 %v2726_v31, %v763_v6  ;;  %v1101_v30 = vld [vmem:[#allocation6 + $0x30] sm:$0xff]  ;;  %v1104_v31 = vld [vmem:[#allocation6 + $0x48] sm:$0xff] }
 0xad2   :  { %v856_v36 = vadd.f32 1.0, %v2728_v8  ;;  %v2448_v35 = vpack.c.bf16 %v1101_v30, %v1099_v28  ;;  %v1269_v28 = vld [vmem:[#allocation8 + $0x48] sm:$0xff]  ;;  %v1271_v30 = vld [vmem:[#allocation8 + $0x58] sm:$0xff] }
 0xad3   :  { %865 = vrot.lane.b32.xlu0 %v863_v34, %s2955_s1  ;;  %v1106_v34 = vld [vmem:[#allocation6 + $0x58] sm:$0xff] }
 0xad4   :  { %2729 = vrcp.f32 %v856_v36  ;;  %v2450_v8 = vpack.c.bf16 %v1106_v34, %v1104_v31  ;;  %v2466_v34 = vpack.c.bf16 %v1271_v30, %v1269_v28 }
 0xade   :  { %v2730_v7 = vpop.eup %2729 }
 0xb45   :  { %v866_v44 = vpop.permute.xlu0 %865 }
 0xb46   :  { %v868_v45 = vadd.f32 %v866_v44, %v862_v37 }
 0xb48   :  { %2731 = vtanh.f32 %v868_v45 }
 0xb52   :  { %v2732_v46 = vpop.eup %2731 }
 0xb53   :  { %v870_v47 = vmul.f32 %v2732_v46, %v2730_v7 }
 0xb55   :  { %872 = vrot.lane.b32.xlu1 %v870_v47, %s2955_s1  ;;  %v1103_v47 = vld [vmem:[#allocation6 + $0x40] sm:$0xff] }
 0xbc7   :  { %v873_v48 = vpop.permute.xlu1 %872 }
 0xbc8   :  { %875 = vst.msk [vmem:[#allocation2 + $0x28] sm:$0xff] %vm348_vm0, %v873_v48  ;;  %2267 = vmatmul.mubr.msk.f32.vlgmr.msra.gmra.mrb[4].mxu0 %vm245_vm2, %v873_v48 }
 0xbc9   :  { %876 = vst.msk [vmem:[#allocation2 + $0x10] sm:$0xff] %vm350_vm1, %v873_v48  ;;  %1573 = vmatprep.mubr.f32.mxu0 %v2953_v1  ;;  %v1105_v48 = vld [vmem:[#allocation6 + $0x50] sm:$0xff] }
 0xbca   :  { %v2452_v49 = vpack.c.bf16 %v1105_v48, %v1103_v47  ;;  %v1274_v47 = vld [vmem:[#allocation8 + $0x70] sm:$0xff] }
 0xbd0   :  { %v1089_v48 = vld [vmem:[#allocation2 + $0x10] sm:$0xff] }
 0xc9b   :  { %v947_v55 = vpop.f32.mrb[4].mxu0 }
 0xc9c   :  { %v952_v56 = vadd.f32 %v947_v55, %v877_v54  ;;  %v949_v57 = vpop.f32.mrb[5].mxu0  ;;  %v1107_v54 = vld [vmem:[#allocation6 + $0x60] sm:$0xff]  ;;  %v2454_v55 = vpack.c.bf16 %v1110_v53, %v1108_v50  ;;  %v1090_v50 = vld [vmem:[#allocation2 + $0x18] sm:$0xff] }
 0xc9d   :  { %v953_v0 = vadd.f32 %v949_v57, %v878_v38  ;;  %v1261_v57 = vld [vmem:[#allocation8 + $0x8] sm:$0xff]  ;;  %v1091_v53 = vld [vmem:[#allocation2 + $0x20] sm:$0xff] }
 0xc9e   :  { %v2268_v61 = vmul.f32 -1.442695, %v952_v56  ;;  %v1109_v56 = vld [vmem:[#allocation6 + $0x70] sm:$0xff]  ;;  %v2458_v62 = vpack.c.bf16 %v1263_v60, %v1261_v57  ;;  %v1111_v57 = vld [vmem:[%s3559_s8] sm:$0x3] }
 0xc9f   :  { %v2269_v4 = vmul.f32 -1.442695, %v953_v0  ;;  %v1116_v60 = vrot.slane %v1111_v57, %v3148_v32 }
 0xca0   :  { %2733 = vpow2.f32 %v2268_v61  ;;  %v2456_v61 = vpack.c.bf16 %v1109_v56, %v1107_v54  ;;  %v1092_v54 = vld [vmem:[#allocation2 + $0x28] sm:$0xff] }
 0xca1   :  { %2735 = vtanh.f32 %v953_v0 }
 0xcaa   :  { %v2734_v42 = vpop.eup %2733 }
 0xcab   :  { %v960_v2 = vadd.f32 1.0, %v2734_v42  ;;  %v2736_v40 = vpop.eup %2735  ;;  %v1390_v42 = vld [vmem:[#allocation9 + $0x8] sm:$0xff] }
 0xcad   :  { %2737 = vrcp.f32 %v960_v2  ;;  %v1392_v2 = vld [vmem:[#allocation9 + $0x18] sm:$0xff] }
 0xcae   :  { %2739 = vpow2.f32 %v2269_v4 }
 0xcb7   :  { %v2738_v3 = vpop.eup %2737 }
 0xcb8   :  { %v968_v59 = vmul.f32 %v2738_v3, %v2736_v40  ;;  %v2740_v39 = vpop.eup %2739  ;;  %v967_v5 = vmul.f32 %v2738_v3, %v868_v45  ;;  %v3354_v40 = vpack.c.bf16 %v1392_v2, %v1390_v42  ;;  %v1389_v3 = vld [vmem:[#allocation9] sm:$0xff] }
 0xcb9   :  { %v961_v27 = vadd.f32 1.0, %v2740_v39  ;;  %v1394_v39 = vld [vmem:[#allocation9 + $0x28] sm:$0xff] }
 0xcba   :  { %970 = vrot.lane.b32.xlu0 %v968_v59, %s2955_s1  ;;  %2491 = vmatprep.subr.bf16.mxu0 %v3354_v40  ;;  %v1391_v59 = vld [vmem:[#allocation9 + $0x10] sm:$0xff] }
 0xcbb   :  { %2741 = vrcp.f32 %v961_v27  ;;  %v3357_v4 = vpack.c.bf16 %v1391_v59, %v1389_v3  ;;  %v1396_v27 = vld [vmem:[#allocation9 + $0x38] sm:$0xff] }
 0xcbd   :  { %2493 = vmatpush1.bf16.msra.mxu0 %v3357_v4 }
 0xcc5   :  { %v2742_v41 = vpop.eup %2741 }
 0xd2c   :  { %v971_v43 = vpop.permute.xlu0 %970 }
 0xd2d   :  { %v973_v9 = vadd.f32 %v971_v43, %v967_v5  ;;  %v1393_v5 = vld [vmem:[#allocation9 + $0x20] sm:$0xff]  ;;  %v3360_v43 = vpack.c.bf16 %v1396_v27, %v1394_v39 }
 0xd2f   :  { %2743 = vtanh.f32 %v973_v9  ;;  %2495 = vmatprep.subr.bf16.mxu0 %v3360_v43 }
 0xd39   :  { %v2744_v26 = vpop.eup %2743 }
 0xd3a   :  { %v975_v6 = vmul.f32 %v2744_v26, %v2742_v41  ;;  %v1398_v26 = vld [vmem:[#allocation9 + $0x48] sm:$0xff] }
 0xd3c   :  { %977 = vrot.lane.b32.xlu1 %v975_v6, %s2955_s1  ;;  %v1400_v6 = vld [vmem:[#allocation9 + $0x58] sm:$0xff] }
 0xdae   :  { %v978_v58 = vpop.permute.xlu1 %977 }
 0xdaf   :  { %980 = vst.msk [vmem:[#allocation2 + $0x30] sm:$0xff] %vm348_vm0, %v978_v58  ;;  %2270 = vmatmul.mubr.msk.f32.vlgmr.msra.gmra.mrb[8].mxu1 %vm245_vm2, %v978_v58 }
 0xdb0   :  { %981 = vst.msk [vmem:[#allocation2 + $0x8] sm:$0xff] %vm350_vm1, %v978_v58  ;;  %1211 = vmatprep.mubr.f32.mxu1 %v2953_v1  ;;  %2445 = vmatpush1.bf16.msra.mxu1 %v2444_v23  ;;  %v1397_v58 = vld [vmem:[#allocation9 + $0x40] sm:$0xff]  ;;  %v1266_v23 = vld [vmem:[#allocation8 + $0x30] sm:$0xff] }
 0xe82   :  { %v1052_v12 = vpop.f32.mrb[8].mxu1 }
 0xe83   :  { %v1057_v13 = vadd.f32 %v1052_v12, %v3185_v51  ;;  %v1054_v14 = vpop.f32.mrb[9].mxu1  ;;  %v1100_v51 = vld [vmem:[#allocation6 + $0x28] sm:$0xff]  ;;  %v3366_v12 = vpack.c.bf16 %v1400_v6, %v1398_v26 }
 0xe84   :  { %v1058_v15 = vadd.f32 %v1054_v14, %v3187_v52  ;;  %v2446_v52 = vpack.c.bf16 %v1102_v22, %v1100_v51  ;;  %v2462_v51 = vpack.c.bf16 %v1267_v29, %v1265_v25  ;;  %v1264_v22 = vld [vmem:[#allocation8 + $0x20] sm:$0xff] }
 0xe85   :  { %v2271_v18 = vmul.f32 -1.442695, %v1057_v13  ;;  %v1399_v13 = vld [vmem:[#allocation9 + $0x50] sm:$0xff]  ;;  %v2464_v31 = vpack.c.bf16 %v1266_v23, %v1264_v22 }
 0xe86   :  { %2447 = vmatprep.subr.bf16.mxu1 %v2446_v52  ;;  %v2272_v36 = vmul.f32 -1.442695, %v1058_v15  ;;  %v3368_v14 = vpack.c.bf16 %v1399_v13, %v1397_v58 }
 0xe87   :  { %2745 = vpow2.f32 %v2271_v18  ;;  %2449 = vmatpush1.bf16.msra.mxu1 %v2448_v35  ;;  %v1404_v18 = vld [vmem:[#allocation9 + $0x78] sm:$0xff]  ;;  %v1268_v35 = vld [vmem:[#allocation8 + $0x40] sm:$0xff] }
 0xe88   :  { %2747 = vtanh.f32 %v1058_v15  ;;  %2451 = vmatprep.subr.bf16.mxu1 %v2450_v8  ;;  %v1402_v15 = vld [vmem:[#allocation9 + $0x68] sm:$0xff]  ;;  %v1270_v8 = vld [vmem:[#allocation8 + $0x50] sm:$0xff] }
 0xe8b   :  { %2453 = vmatpush1.bf16.msra.mxu1 %v2452_v49 }
 0xe8c   :  { %2455 = vmatprep.subr.bf16.mxu1 %v2454_v55  ;;  %v1093_v55 = vld [vmem:[#allocation2 + $0x30] sm:$0xff] }
 0xe8f   :  { %2457 = vmatpush1.bf16.msra.mxu1 %v2456_v61  ;;  %v1120_v61 = vrot.slane %v1111_v57, %v3150_v33 }
 0xe90   :  { %2459 = vmatprep.subr.bf16.mxu1 %v2458_v62 }
 0xe91   :  { %v2746_v10 = vpop.eup %2745 }
 0xe92   :  { %v1065_v19 = vadd.f32 1.0, %v2746_v10  ;;  %v2748_v11 = vpop.eup %2747  ;;  %v3372_v10 = vpack.c.bf16 %v1404_v18, %v1402_v15 }
 0xe94   :  { %2749 = vrcp.f32 %v1065_v19  ;;  %v1401_v19 = vld [vmem:[#allocation9 + $0x60] sm:$0xff] }
 0xe95   :  { %2751 = vpow2.f32 %v2272_v36  ;;  %v1088_v36 = vld [vmem:[#allocation2 + $0x8] sm:$0xff] }
 0xe9e   :  { %v2750_v20 = vpop.eup %2749 }
 0xe9f   :  { %v1073_v16 = vmul.f32 %v2750_v20, %v2748_v11  ;;  %v2752_v37 = vpop.eup %2751  ;;  %v1072_v45 = vmul.f32 %v2750_v20, %v973_v9  ;;  %v1395_v9 = vld [vmem:[#allocation9 + $0x30] sm:$0xff] }
 0xea0   :  { %v1066_v44 = vadd.f32 1.0, %v2752_v37  ;;  %v3362_v41 = vpack.c.bf16 %v1395_v9, %v1393_v5  ;;  %v1403_v11 = vld [vmem:[#allocation9 + $0x70] sm:$0xff]  ;;  %v1273_v37 = vld [vmem:[#allocation8 + $0x68] sm:$0xff] }
 0xea1   :  { %1075 = vrot.lane.b32.xlu0 %v1073_v16, %s2955_s1  ;;  %v3374_v20 = vpack.c.bf16 %v1403_v11, %v1401_v19 }
 0xea2   :  { %2753 = vrcp.f32 %v1066_v44  ;;  %2497 = vmatpush1.bf16.msra.mxu0 %v3362_v41  ;;  %v1275_v44 = vld [vmem:[#allocation8 + $0x78] sm:$0xff] }
 0xea3   :  { %2499 = vmatprep.subr.bf16.mxu0 %v3366_v12 }
 0xea6   :  { %2501 = vmatpush1.bf16.msra.mxu0 %v3368_v14 }
 0xea7   :  { %2503 = vmatprep.subr.bf16.mxu0 %v3372_v10 }
 0xeaa   :  { %2505 = vmatpush1.bf16.msra.mxu0 %v3374_v20 }
 0xeab   :  { %2507 = vmatprep.subr.bf16.mxu0 %v3354_v40 }
 0xeac   :  { %v2754_v63 = vpop.eup %2753 }
 0xf13   :  { %v1076_v7 = vpop.permute.xlu0 %1075 }
 0xf14   :  { %v1078_v46 = vadd.f32 %v1076_v7, %v1072_v45  ;;  %v2468_v45 = vpack.c.bf16 %v1270_v8, %v1268_v35  ;;  %v2470_v7 = vpack.c.bf16 %v1275_v44, %v1273_v37 }
 0xf16   :  { %2755 = vtanh.f32 %v1078_v46  ;;  %v1272_v46 = vld [vmem:[#allocation8 + $0x60] sm:$0xff] }
 0xf17   :  { %v2472_v49 = vpack.c.bf16 %v1274_v47, %v1272_v46 }
 0xf20   :  { %v2756_v38 = vpop.eup %2755 }
 0xf21   :  { %v1080_v0 = vmul.f32 %v2756_v38, %v2754_v63 }
 0xf23   :  { %1082 = vrot.lane.b32.xlu1 %v1080_v0, %s2955_s1 }
 0xf95   :  { %v1083_v16 = vpop.permute.xlu1 %1082 }
 0xf96   :  { %1085 = vst.msk [vmem:[#allocation2 + $0x38] sm:$0xff] %vm348_vm0, %v1083_v16 }
 0xf97   :  { %1086 = vst.msk [vmem:[#allocation2] sm:$0xff] %vm350_vm1, %v1083_v16 }
 0xf9d   :  { %v1094_v56 = vld [vmem:[#allocation2 + $0x38] sm:$0xff] }
 0xf9e   :  { %v1087_v52 = vld [vmem:[#allocation2] sm:$0xff] }
 0xf9f   :  { %2273 = vmatmul.mubr.msk.f32.vlgmr.msra.gmra.mrb[10].mxu1 %vm245_vm2, %v1087_v52 }
 0xfa0   :  { %2461 = vmatpush1.bf16.msra.mxu1 %v2460_v21  ;;  %1217 = vmatprep.mubr.f32.mxu1 %v2953_v1 }
 0xfa1   :  { %2463 = vmatprep.subr.bf16.mxu1 %v2462_v51 }
 0xfa3   :  { %2274 = vmatmul.mubr.msk.f32.gmra.mrb[12].mxu1 %vm245_vm2, %v1088_v36 }
 0xfa4   :  { %1223 = vmatprep.mubr.f32.mxu1 %v2953_v1  ;;  %2465 = vmatpush1.bf16.msra.mxu1 %v2464_v31 }
 0xfa5   :  { %2467 = vmatprep.subr.bf16.mxu1 %v2466_v34 }
 0xfa7   :  { %2275 = vmatmul.mubr.msk.f32.gmra.mrb[14].mxu1 %vm245_vm2, %v1089_v48 }
 0xfa8   :  { %1229 = vmatprep.mubr.f32.mxu1 %v2953_v1  ;;  %2469 = vmatpush1.bf16.msra.mxu1 %v2468_v45 }
 0xfa9   :  { %2471 = vmatprep.subr.bf16.mxu1 %v2470_v7 }
 0xfab   :  { %2276 = vmatmul.mubr.msk.f32.gmra.mrb[16].mxu1 %vm245_vm2, %v1090_v50 }
 0xfac   :  { %1235 = vmatprep.mubr.f32.mxu1 %v2953_v1  ;;  %2473 = vmatpush1.bf16.msra.mxu1 %v2472_v49 }
 0xfad   :  { %2475 = vmatprep.subr.bf16.mxu1 %v3354_v40 }
 0xfaf   :  { %2277 = vmatmul.mubr.msk.f32.gmra.mrb[18].mxu1 %vm245_vm2, %v1091_v53 }
 0xfb0   :  { %1241 = vmatprep.mubr.f32.mxu1 %v2953_v1 }
 0xfb3   :  { %2278 = vmatmul.mubr.msk.f32.gmra.mrb[20].mxu1 %vm245_vm2, %v1092_v54 }
 0xfb4   :  { %1247 = vmatprep.mubr.f32.mxu1 %v2953_v1 }
 0xfb7   :  { %2279 = vmatmul.mubr.msk.f32.gmra.mrb[22].mxu1 %vm245_vm2, %v1093_v55 }
 0xfb8   :  { %1253 = vmatprep.mubr.f32.mxu1 %v2953_v1 }
 0xfbb   :  { %2280 = vmatmul.mubr.msk.f32.gmra.mrb[24].mxu1 %vm245_vm2, %v1094_v56 }
 0xfbc   :  { %1340 = vmatprep.mubr.f32.mxu1 %v2953_v1 }
 0xfc3   :  { %2281 = vmatmul.mubr.msk.f32.vlgmr.msra.gmra.mrb[24].mxu1 %vm245_vm2, %v1087_v52 }
 0xfc4   :  { %2477 = vmatpush1.bf16.msra.mxu1 %v3357_v4  ;;  %1346 = vmatprep.mubr.f32.mxu1 %v2953_v1 }
 0xfc5   :  { %2479 = vmatprep.subr.bf16.mxu1 %v3360_v43 }
 0xfc7   :  { %2282 = vmatmul.mubr.msk.f32.gmra.mrb[22].mxu1 %vm245_vm2, %v1088_v36 }
 0xfc8   :  { %1352 = vmatprep.mubr.f32.mxu1 %v2953_v1  ;;  %2481 = vmatpush1.bf16.msra.mxu1 %v3362_v41 }
 0xfc9   :  { %2483 = vmatprep.subr.bf16.mxu1 %v3366_v12 }
 0xfcb   :  { %2283 = vmatmul.mubr.msk.f32.gmra.mrb[20].mxu1 %vm245_vm2, %v1089_v48 }
 0xfcc   :  { %1358 = vmatprep.mubr.f32.mxu1 %v2953_v1  ;;  %2485 = vmatpush1.bf16.msra.mxu1 %v3368_v14 }
 0xfcd   :  { %2487 = vmatprep.subr.bf16.mxu1 %v3372_v10 }
 0xfcf   :  { %2284 = vmatmul.mubr.msk.f32.gmra.mrb[18].mxu1 %vm245_vm2, %v1090_v50 }
 0xfd0   :  { %1364 = vmatprep.mubr.f32.mxu1 %v2953_v1  ;;  %2489 = vmatpush1.bf16.msra.mxu1 %v3374_v20 }
 0xfd3   :  { %2285 = vmatmul.mubr.msk.f32.gmra.mrb[16].mxu1 %vm245_vm2, %v1091_v53 }
 0xfd4   :  { %1370 = vmatprep.mubr.f32.mxu1 %v2953_v1 }
 0xfd7   :  { %2286 = vmatmul.mubr.msk.f32.gmra.mrb[14].mxu1 %vm245_vm2, %v1092_v54 }
 0xfd8   :  { %1376 = vmatprep.mubr.f32.mxu1 %v2953_v1 }
 0xfdb   :  { %2287 = vmatmul.mubr.msk.f32.gmra.mrb[12].mxu1 %vm245_vm2, %v1093_v55 }
 0xfdc   :  { %1382 = vmatprep.mubr.f32.mxu1 %v2953_v1 }
 0xfdf   :  { %2288 = vmatmul.mubr.msk.f32.gmra.mrb[10].mxu1 %vm245_vm2, %v1094_v56 }
 0xfe0   :  { %1471 = vmatprep.mubr.f32.mxu1 %v2953_v1 }
 0xfe7   :  { %1472 = vmatmul.mubr.f32.vlgmr.msra.gmra.mrb[10].mxu1 %v2953_v1 }
0x1096   :  { %v1342_v62 = vpop.f32.mrb[24].mxu1 }
0x1097   :  { %v3427_v63 = vadd.f32 %v1342_v62, %v1116_v60  ;;  %v1344_v38 = vpop.f32.mrb[25].mxu1 }
0x1098   :  { %v3429_v0 = vadd.f32 %v1344_v38, %v1120_v61 }
0x109a   :  { %v1348_v42 = vpop.f32.mrb[22].mxu1 }
0x109b   :  { %v3431_v2 = vadd.f32 %v1348_v42, %v1116_v60  ;;  %v1350_v3 = vpop.f32.mrb[23].mxu1 }
0x109c   :  { %v3433_v59 = vadd.f32 %v1350_v3, %v1120_v61 }
0x109e   :  { %v1354_v39 = vpop.f32.mrb[20].mxu1 }
0x109f   :  { %v3435_v27 = vadd.f32 %v1354_v39, %v1116_v60  ;;  %v1356_v5 = vpop.f32.mrb[21].mxu1 }
0x10a0   :  { %v3437_v9 = vadd.f32 %v1356_v5, %v1120_v61 }
0x10a2   :  { %v1360_v32 = vpop.f32.mrb[18].mxu1 }
0x10a3   :  { %v3439_v33 = vadd.f32 %v1360_v32, %v1116_v60  ;;  %v1362_v26 = vpop.f32.mrb[19].mxu1 }
0x10a4   :  { %v3441_v6 = vadd.f32 %v1362_v26, %v1120_v61 }
0x10a6   :  { %v1366_v58 = vpop.f32.mrb[16].mxu1 }
0x10a7   :  { %v3443_v13 = vadd.f32 %v1366_v58, %v1116_v60  ;;  %v1368_v15 = vpop.f32.mrb[17].mxu1 }
0x10a8   :  { %v3445_v18 = vadd.f32 %v1368_v15, %v1120_v61 }
0x10aa   :  { %v1372_v19 = vpop.f32.mrb[14].mxu1 }
0x10ab   :  { %v3447_v11 = vadd.f32 %v1372_v19, %v1116_v60  ;;  %v1374_v16 = vpop.f32.mrb[15].mxu1 }
0x10ac   :  { %v3449_v17 = vadd.f32 %v1374_v16, %v1120_v61 }
0x10ae   :  { %v1378_v24 = vpop.f32.mrb[12].mxu1 }
0x10af   :  { %v2604_v25 = vadd.f32 %v1378_v24, %v1116_v60  ;;  %v1380_v29 = vpop.f32.mrb[13].mxu1 }
0x10b0   :  { %v2606_v21 = vadd.f32 %v1380_v29, %v1120_v61 }
0x10ba   :  { %v1473_v51 = vpop.f32.mrb[10].mxu1 }
0x10bb   :  { %v2602_v22 = vadd.f32 %v1473_v51, %v1116_v60  ;;  %v1475_v23 = vpop.f32.mrb[11].mxu1 }
0x10bc   :  { %v2603_v28 = vadd.f32 %v1475_v23, %v1120_v61 }
0x10bd   :  { %v2289_v52 = vmul.f32 -1.442695, %v2602_v22 }
0x10be   :  { %v2290_v36 = vmul.f32 -1.442695, %v2603_v28 }
0x10bf   :  { %2757 = vpow2.f32 %v2289_v52 }
0x10c0   :  { %2759 = vtanh.f32 %v2603_v28 }
0x10c9   :  { %v2758_v30 = vpop.eup %2757 }
0x10ca   :  { %v1486_v31 = vadd.f32 1.0, %v2758_v30  ;;  %v2760_v34 = vpop.eup %2759 }
0x10cc   :  { %2761 = vrcp.f32 %v1486_v31 }
0x10cd   :  { %2763 = vpow2.f32 %v2290_v36 }
0x10d6   :  { %v2762_v35 = vpop.eup %2761 }
0x10d7   :  { %v1494_v8 = vmul.f32 %v2762_v35, %v2760_v34  ;;  %v2764_v37 = vpop.eup %2763  ;;  %v1493_v45 = vmul.f32 0.0, %v2762_v35 }
0x10d8   :  { %v1487_v44 = vadd.f32 1.0, %v2764_v37 }
0x10d9   :  { %1496 = vrot.lane.b32.xlu0 %v1494_v8, %s2955_s1 }
0x10da   :  { %2765 = vrcp.f32 %v1487_v44 }
0x10e4   :  { %v2766_v47 = vpop.eup %2765 }
0x114b   :  { %v1497_v7 = vpop.permute.xlu0 %1496 }
0x114c   :  { %v1499_v46 = vadd.f32 %v1497_v7, %v1493_v45 }
0x114e   :  { %2767 = vtanh.f32 %v1499_v46 }
0x1158   :  { %v2768_v48 = vpop.eup %2767 }
0x1159   :  { %v1501_v49 = vmul.f32 %v2768_v48, %v2766_v47 }
0x115b   :  { %1505 = vrot.lane.b32.xlu1 %v1501_v49, %s2955_s1 }
0x11cd   :  { %v3453_v50 = vpop.permute.xlu1 %1505 }
0x11ce   :  { %2291 = vmatmul.mubr.msk.f32.vlgmr.msra.gmra.mrb[6].mxu0 %vm245_vm2, %v3453_v50 }
0x11cf   :  { %2509 = vmatpush1.bf16.msra.mxu0 %v3357_v4  ;;  %1675 = vmatprep.mubr.f32.mxu0 %v2953_v1 }
0x11d0   :  { %2511 = vmatprep.subr.bf16.mxu0 %v3360_v43 }
0x11d3   :  { %2513 = vmatpush1.bf16.msra.mxu0 %v3362_v41 }
0x11d4   :  { %2515 = vmatprep.subr.bf16.mxu0 %v3366_v12 }
0x11d7   :  { %2517 = vmatpush1.bf16.msra.mxu0 %v3368_v14 }
0x11d8   :  { %2519 = vmatprep.subr.bf16.mxu0 %v3372_v10 }
0x11db   :  { %2521 = vmatpush1.bf16.msra.mxu0 %v3374_v20 }
0x11dc   :  { %2523 = vmatprep.subr.bf16.mxu0 %v3354_v40 }
0x12a1   :  { %v1575_v53 = vpop.f32.mrb[6].mxu0 }
0x12a2   :  { %v2605_v54 = vadd.f32 %v2604_v25, %v1575_v53  ;;  %v1577_v55 = vpop.f32.mrb[7].mxu0 }
0x12a3   :  { %v2607_v56 = vadd.f32 %v2606_v21, %v1577_v55 }
0x12a4   :  { %v2292_v57 = vmul.f32 -1.442695, %v2605_v54 }
0x12a5   :  { %v2293_v3 = vmul.f32 -1.442695, %v2607_v56 }
0x12a6   :  { %2769 = vpow2.f32 %v2292_v57 }
0x12a7   :  { %2771 = vtanh.f32 %v2607_v56 }
0x12b0   :  { %v2770_v60 = vpop.eup %2769 }
0x12b1   :  { %v1588_v61 = vadd.f32 1.0, %v2770_v60  ;;  %v2772_v62 = vpop.eup %2771 }
0x12b3   :  { %2773 = vrcp.f32 %v1588_v61 }
0x12b4   :  { %2775 = vpow2.f32 %v2293_v3 }
0x12bd   :  { %v2774_v38 = vpop.eup %2773 }
0x12be   :  { %v1596_v42 = vmul.f32 %v2774_v38, %v2772_v62  ;;  %v2776_v39 = vpop.eup %2775  ;;  %v1595_v32 = vmul.f32 %v2774_v38, %v1499_v46 }
0x12bf   :  { %v1589_v5 = vadd.f32 1.0, %v2776_v39 }
0x12c0   :  { %1598 = vrot.lane.b32.xlu0 %v1596_v42, %s2955_s1 }
0x12c1   :  { %2777 = vrcp.f32 %v1589_v5 }
0x12cb   :  { %v2778_v15 = vpop.eup %2777 }
0x1332   :  { %v1599_v26 = vpop.permute.xlu0 %1598 }
0x1333   :  { %v1601_v58 = vadd.f32 %v1599_v26, %v1595_v32 }
0x1335   :  { %2779 = vtanh.f32 %v1601_v58 }
0x133f   :  { %v2780_v19 = vpop.eup %2779 }
0x1340   :  { %v1603_v16 = vmul.f32 %v2780_v19, %v2778_v15 }
0x1342   :  { %1607 = vrot.lane.b32.xlu1 %v1603_v16, %s2955_s1 }
0x13b4   :  { %v1608_v24 = vpop.permute.xlu1 %1607 }
0x13b5   :  { %2294 = vmatmul.mubr.msk.f32.vlgmr.msra.gmra.mrb[8].mxu0 %vm245_vm2, %v1608_v24 }
0x13b6   :  { %2525 = vmatpush1.bf16.msra.mxu0 %v3357_v4  ;;  %1777 = vmatprep.mubr.f32.mxu0 %v2953_v1 }
0x13b7   :  { %2527 = vmatprep.subr.bf16.mxu0 %v3360_v43 }
0x13ba   :  { %2529 = vmatpush1.bf16.msra.mxu0 %v3362_v41 }
0x13bb   :  { %2531 = vmatprep.subr.bf16.mxu0 %v3366_v12 }
0x13be   :  { %2533 = vmatpush1.bf16.msra.mxu0 %v3368_v14 }
0x13bf   :  { %2535 = vmatprep.subr.bf16.mxu0 %v3372_v10 }
0x13c2   :  { %2537 = vmatpush1.bf16.msra.mxu0 %v3374_v20 }
0x13c3   :  { %2539 = vmatprep.subr.bf16.mxu0 %v3354_v40 }
0x1488   :  { %v1677_v25 = vpop.f32.mrb[8].mxu0 }
0x1489   :  { %v2609_v29 = vadd.f32 %v3447_v11, %v1677_v25  ;;  %v1679_v21 = vpop.f32.mrb[9].mxu0 }
0x148a   :  { %v2611_v51 = vadd.f32 %v3449_v17, %v1679_v21 }
0x148b   :  { %v2295_v22 = vmul.f32 -1.442695, %v2609_v29 }
0x148c   :  { %v2296_v34 = vmul.f32 -1.442695, %v2611_v51 }
0x148d   :  { %2781 = vpow2.f32 %v2295_v22 }
0x148e   :  { %2783 = vtanh.f32 %v2611_v51 }
0x1497   :  { %v2782_v23 = vpop.eup %2781 }
0x1498   :  { %v1690_v52 = vadd.f32 1.0, %v2782_v23  ;;  %v2784_v28 = vpop.eup %2783 }
0x149a   :  { %2785 = vrcp.f32 %v1690_v52 }
0x149b   :  { %2787 = vpow2.f32 %v2296_v34 }
0x14a4   :  { %v2786_v30 = vpop.eup %2785 }
0x14a5   :  { %v1698_v31 = vmul.f32 %v2786_v30, %v2784_v28  ;;  %v2788_v35 = vpop.eup %2787  ;;  %v1697_v36 = vmul.f32 %v2786_v30, %v1601_v58 }
0x14a6   :  { %v1691_v8 = vadd.f32 1.0, %v2788_v35 }
0x14a7   :  { %1700 = vrot.lane.b32.xlu0 %v1698_v31, %s2955_s1 }
0x14a8   :  { %2789 = vrcp.f32 %v1691_v8 }
0x14b2   :  { %v2790_v17 = vpop.eup %2789 }
0x1519   :  { %v1701_v11 = vpop.permute.xlu0 %1700 }
0x151a   :  { %v1703_v37 = vadd.f32 %v1701_v11, %v1697_v36 }
0x151c   :  { %2791 = vtanh.f32 %v1703_v37 }
0x1526   :  { %v2792_v44 = vpop.eup %2791 }
0x1527   :  { %v1705_v45 = vmul.f32 %v2792_v44, %v2790_v17 }
0x1529   :  { %1709 = vrot.lane.b32.xlu1 %v1705_v45, %s2955_s1 }
0x159b   :  { %v1710_v7 = vpop.permute.xlu1 %1709 }
0x159c   :  { %2297 = vmatmul.mubr.msk.f32.vlgmr.msra.gmra.mrb[10].mxu0 %vm245_vm2, %v1710_v7 }
0x159d   :  { %2541 = vmatpush1.bf16.msra.mxu0 %v3357_v4  ;;  %1879 = vmatprep.mubr.f32.mxu0 %v2953_v1 }
0x159e   :  { %2543 = vmatprep.subr.bf16.mxu0 %v3360_v43 }
0x15a1   :  { %2545 = vmatpush1.bf16.msra.mxu0 %v3362_v41 }
0x15a2   :  { %2547 = vmatprep.subr.bf16.mxu0 %v3366_v12 }
0x15a5   :  { %2549 = vmatpush1.bf16.msra.mxu0 %v3368_v14 }
0x15a6   :  { %2551 = vmatprep.subr.bf16.mxu0 %v3372_v10 }
0x15a9   :  { %2553 = vmatpush1.bf16.msra.mxu0 %v3374_v20 }
0x15aa   :  { %2555 = vmatprep.subr.bf16.mxu0 %v3354_v40 }
0x166f   :  { %v1779_v46 = vpop.f32.mrb[10].mxu0 }
0x1670   :  { %v2613_v47 = vadd.f32 %v3443_v13, %v1779_v46  ;;  %v1781_v48 = vpop.f32.mrb[11].mxu0 }
0x1671   :  { %v2615_v49 = vadd.f32 %v3445_v18, %v1781_v48 }
0x1672   :  { %v2298_v53 = vmul.f32 -1.442695, %v2613_v47 }
0x1673   :  { %v2299_v61 = vmul.f32 -1.442695, %v2615_v49 }
0x1674   :  { %2793 = vpow2.f32 %v2298_v53 }
0x1675   :  { %2795 = vtanh.f32 %v2615_v49 }
0x167e   :  { %v2794_v54 = vpop.eup %2793 }
0x167f   :  { %v1792_v55 = vadd.f32 1.0, %v2794_v54  ;;  %v2796_v56 = vpop.eup %2795 }
0x1681   :  { %2797 = vrcp.f32 %v1792_v55 }
0x1682   :  { %2799 = vpow2.f32 %v2299_v61 }
0x168b   :  { %v2798_v57 = vpop.eup %2797 }
0x168c   :  { %v1800_v60 = vmul.f32 %v2798_v57, %v2796_v56  ;;  %v2800_v62 = vpop.eup %2799  ;;  %v1799_v42 = vmul.f32 %v2798_v57, %v1703_v37 }
0x168d   :  { %v1793_v38 = vadd.f32 1.0, %v2800_v62 }
0x168e   :  { %1802 = vrot.lane.b32.xlu0 %v1800_v60, %s2955_s1 }
0x168f   :  { %2801 = vrcp.f32 %v1793_v38 }
0x1699   :  { %v2802_v18 = vpop.eup %2801 }
0x1700   :  { %v1803_v13 = vpop.permute.xlu0 %1802 }
0x1701   :  { %v1805_v3 = vadd.f32 %v1803_v13, %v1799_v42 }
0x1703   :  { %2803 = vtanh.f32 %v1805_v3 }
0x170d   :  { %v2804_v39 = vpop.eup %2803 }
0x170e   :  { %v1807_v5 = vmul.f32 %v2804_v39, %v2802_v18 }
0x1710   :  { %1811 = vrot.lane.b32.xlu1 %v1807_v5, %s2955_s1 }
0x1782   :  { %v1812_v32 = vpop.permute.xlu1 %1811 }
0x1783   :  { %2300 = vmatmul.mubr.msk.f32.vlgmr.msra.gmra.mrb[12].mxu0 %vm245_vm2, %v1812_v32 }
0x1784   :  { %2557 = vmatpush1.bf16.msra.mxu0 %v3357_v4  ;;  %1981 = vmatprep.mubr.f32.mxu0 %v2953_v1 }
0x1785   :  { %2559 = vmatprep.subr.bf16.mxu0 %v3360_v43 }
0x1788   :  { %2561 = vmatpush1.bf16.msra.mxu0 %v3362_v41 }
0x1789   :  { %2563 = vmatprep.subr.bf16.mxu0 %v3366_v12 }
0x178c   :  { %2565 = vmatpush1.bf16.msra.mxu0 %v3368_v14 }
0x178d   :  { %2567 = vmatprep.subr.bf16.mxu0 %v3372_v10 }
0x1790   :  { %2569 = vmatpush1.bf16.msra.mxu0 %v3374_v20 }
0x1791   :  { %2571 = vmatprep.subr.bf16.mxu0 %v3354_v40 }
0x1856   :  { %v1881_v26 = vpop.f32.mrb[12].mxu0 }
0x1857   :  { %v2617_v58 = vadd.f32 %v3439_v33, %v1881_v26  ;;  %v1883_v15 = vpop.f32.mrb[13].mxu0 }
0x1858   :  { %v2619_v19 = vadd.f32 %v3441_v6, %v1883_v15 }
0x1859   :  { %v2301_v16 = vmul.f32 -1.442695, %v2617_v58 }
0x185a   :  { %v2302_v22 = vmul.f32 -1.442695, %v2619_v19 }
0x185b   :  { %2805 = vpow2.f32 %v2301_v16 }
0x185c   :  { %2807 = vtanh.f32 %v2619_v19 }
0x1865   :  { %v2806_v24 = vpop.eup %2805 }
0x1866   :  { %v1894_v25 = vadd.f32 1.0, %v2806_v24  ;;  %v2808_v29 = vpop.eup %2807 }
0x1868   :  { %2809 = vrcp.f32 %v1894_v25 }
0x1869   :  { %2811 = vpow2.f32 %v2302_v22 }
0x1872   :  { %v2810_v21 = vpop.eup %2809 }
0x1873   :  { %v1902_v51 = vmul.f32 %v2810_v21, %v2808_v29  ;;  %v2812_v23 = vpop.eup %2811  ;;  %v1901_v28 = vmul.f32 %v2810_v21, %v1805_v3 }
0x1874   :  { %v1895_v52 = vadd.f32 1.0, %v2812_v23 }
0x1875   :  { %1904 = vrot.lane.b32.xlu0 %v1902_v51, %s2955_s1 }
0x1876   :  { %2813 = vrcp.f32 %v1895_v52 }
0x1880   :  { %v2814_v6 = vpop.eup %2813 }
0x18e7   :  { %v1905_v33 = vpop.permute.xlu0 %1904 }
0x18e8   :  { %v1907_v30 = vadd.f32 %v1905_v33, %v1901_v28 }
0x18ea   :  { %2815 = vtanh.f32 %v1907_v30 }
0x18f4   :  { %v2816_v31 = vpop.eup %2815 }
0x18f5   :  { %v1909_v34 = vmul.f32 %v2816_v31, %v2814_v6  ;;  %v2312_v6 = vld [vmem:[%s3560_s9] ss:$0 sm:$0xff] }
0x18f7   :  { %1913 = vrot.lane.b32.xlu1 %v1909_v34, %s2955_s1 }
0x1969   :  { %v1914_v35 = vpop.permute.xlu1 %1913 }
0x196a   :  { %2303 = vmatmul.mubr.msk.f32.vlgmr.msra.gmra.mrb[14].mxu0 %vm245_vm2, %v1914_v35 }
0x196b   :  { %2573 = vmatpush1.bf16.msra.mxu0 %v3357_v4  ;;  %2083 = vmatprep.mubr.f32.mxu0 %v2953_v1 }
0x196c   :  { %2575 = vmatprep.subr.bf16.mxu0 %v3360_v43 }
0x196f   :  { %2577 = vmatpush1.bf16.msra.mxu0 %v3362_v41 }
0x1970   :  { %2579 = vmatprep.subr.bf16.mxu0 %v3366_v12 }
0x1973   :  { %2581 = vmatpush1.bf16.msra.mxu0 %v3368_v14 }
0x1974   :  { %2583 = vmatprep.subr.bf16.mxu0 %v3372_v10 }
0x1977   :  { %2585 = vmatpush1.bf16.msra.mxu0 %v3374_v20 }
0x1978   :  { %2587 = vmatprep.subr.bf16.mxu0 %v3354_v40 }
0x1a3d   :  { %v1983_v8 = vpop.f32.mrb[14].mxu0 }
0x1a3e   :  { %v2621_v36 = vadd.f32 %v3435_v27, %v1983_v8  ;;  %v1985_v11 = vpop.f32.mrb[15].mxu0 }
0x1a3f   :  { %v2623_v37 = vadd.f32 %v3437_v9, %v1985_v11 }
0x1a40   :  { %v2304_v17 = vmul.f32 -1.442695, %v2621_v36  ;;  %v2313_v36 = vld [vmem:[#allocation3] ss:$0 sm:$0xff] }
0x1a41   :  { %v2305_v48 = vmul.f32 -1.442695, %v2623_v37 }
0x1a42   :  { %2817 = vpow2.f32 %v2304_v17 }
0x1a43   :  { %2819 = vtanh.f32 %v2623_v37 }
0x1a4c   :  { %v2818_v44 = vpop.eup %2817 }
0x1a4d   :  { %v1996_v45 = vadd.f32 1.0, %v2818_v44  ;;  %v2820_v7 = vpop.eup %2819 }
0x1a4f   :  { %2821 = vrcp.f32 %v1996_v45 }
0x1a50   :  { %2823 = vpow2.f32 %v2305_v48 }
0x1a59   :  { %v2822_v46 = vpop.eup %2821 }
0x1a5a   :  { %v2004_v47 = vmul.f32 %v2822_v46, %v2820_v7  ;;  %v2824_v40 = vpop.eup %2823  ;;  %v2003_v53 = vmul.f32 %v2822_v46, %v1907_v30 }
0x1a5b   :  { %v1997_v49 = vadd.f32 1.0, %v2824_v40 }
0x1a5c   :  { %2006 = vrot.lane.b32.xlu0 %v2004_v47, %s2955_s1 }
0x1a5d   :  { %2825 = vrcp.f32 %v1997_v49 }
0x1a67   :  { %v2826_v9 = vpop.eup %2825 }
0x1ace   :  { %v2007_v27 = vpop.permute.xlu0 %2006 }
0x1acf   :  { %v2009_v54 = vadd.f32 %v2007_v27, %v2003_v53 }
0x1ad1   :  { %2827 = vtanh.f32 %v2009_v54 }
0x1adb   :  { %v2828_v55 = vpop.eup %2827 }
0x1adc   :  { %v2011_v56 = vmul.f32 %v2828_v55, %v2826_v9 }
0x1ade   :  { %2015 = vrot.lane.b32.xlu1 %v2011_v56, %s2955_s1 }
0x1b50   :  { %v2016_v57 = vpop.permute.xlu1 %2015 }
0x1b51   :  { %2306 = vmatmul.mubr.msk.f32.vlgmr.msra.gmra.mrb[16].mxu0 %vm245_vm2, %v2016_v57 }
0x1b52   :  { %2589 = vmatpush1.bf16.msra.mxu0 %v3357_v4  ;;  %2185 = vmatprep.mubr.f32.mxu0 %v2953_v1 }
0x1b53   :  { %2591 = vmatprep.subr.bf16.mxu0 %v3360_v43 }
0x1b56   :  { %2593 = vmatpush1.bf16.msra.mxu0 %v3362_v41 }
0x1b57   :  { %2595 = vmatprep.subr.bf16.mxu0 %v3366_v12 }
0x1b5a   :  { %2597 = vmatpush1.bf16.msra.mxu0 %v3368_v14 }
0x1b5b   :  { %2599 = vmatprep.subr.bf16.mxu0 %v3372_v10 }
0x1b5e   :  { %2601 = vmatpush1.bf16.msra.mxu0 %v3374_v20 }
0x1c24   :  { %v2085_v60 = vpop.f32.mrb[16].mxu0 }
0x1c25   :  { %v2625_v61 = vadd.f32 %v3431_v2, %v2085_v60  ;;  %v2087_v62 = vpop.f32.mrb[17].mxu0 }
0x1c26   :  { %v2627_v4 = vadd.f32 %v3433_v59, %v2087_v62 }
0x1c27   :  { %v2307_v38 = vmul.f32 -1.442695, %v2625_v61 }
0x1c28   :  { %v2308_v14 = vmul.f32 -1.442695, %v2627_v4 }
0x1c29   :  { %2829 = vpow2.f32 %v2307_v38 }
0x1c2a   :  { %2831 = vtanh.f32 %v2627_v4 }
0x1c33   :  { %v2830_v1 = vpop.eup %2829 }
0x1c34   :  { %v2098_v43 = vadd.f32 1.0, %v2830_v1  ;;  %v2832_v41 = vpop.eup %2831 }
0x1c36   :  { %2833 = vrcp.f32 %v2098_v43 }
0x1c37   :  { %2835 = vpow2.f32 %v2308_v14 }
0x1c40   :  { %v2834_v12 = vpop.eup %2833 }
0x1c41   :  { %v2106_v42 = vmul.f32 %v2834_v12, %v2832_v41  ;;  %v2836_v10 = vpop.eup %2835  ;;  %v2105_v13 = vmul.f32 %v2834_v12, %v2009_v54 }
0x1c42   :  { %v2099_v20 = vadd.f32 1.0, %v2836_v10 }
0x1c43   :  { %2108 = vrot.lane.b32.xlu0 %v2106_v42, %s2955_s1 }
0x1c44   :  { %2837 = vrcp.f32 %v2099_v20 }
0x1c4e   :  { %v2838_v59 = vpop.eup %2837 }
0x1cb5   :  { %v2109_v2 = vpop.permute.xlu0 %2108 }
0x1cb6   :  { %v2111_v3 = vadd.f32 %v2109_v2, %v2105_v13 }
0x1cb8   :  { %2839 = vtanh.f32 %v2111_v3 }
0x1cc2   :  { %v2840_v18 = vpop.eup %2839 }
0x1cc3   :  { %v2113_v39 = vmul.f32 %v2840_v18, %v2838_v59 }
0x1cc5   :  { %2117 = vrot.lane.b32.xlu1 %v2113_v39, %s2955_s1 }
0x1d37   :  { %v2118_v5 = vpop.permute.xlu1 %2117 }
0x1d38   :  { %2309 = vmatmul.mubr.msk.f32.vlgmr.msra.gmra.mrb[18].mxu0 %vm245_vm2, %v2118_v5 }
0x1e0b   :  { %v2187_v32 = vpop.f32.mrb[18].mxu0 }
0x1e0c   :  { %v2629_v26 = vadd.f32 %v3427_v63, %v2187_v32  ;;  %v2189_v58 = vpop.f32.mrb[19].mxu0 }
0x1e0d   :  { %v2631_v15 = vadd.f32 %v3429_v0, %v2189_v58 }
0x1e0e   :  { %v2310_v19 = vmul.f32 -1.442695, %v2629_v26 }
0x1e0f   :  { %v2311_v51 = vmul.f32 -1.442695, %v2631_v15 }
0x1e10   :  { %2841 = vpow2.f32 %v2310_v19 }
0x1e11   :  { %2843 = vtanh.f32 %v2631_v15 }
0x1e1a   :  { %v2842_v16 = vpop.eup %2841 }
0x1e1b   :  { %v2200_v24 = vadd.f32 1.0, %v2842_v16  ;;  %v2844_v25 = vpop.eup %2843 }
0x1e1d   :  { %2845 = vrcp.f32 %v2200_v24 }
0x1e1e   :  { %2847 = vpow2.f32 %v2311_v51 }
0x1e27   :  { %v2846_v29 = vpop.eup %2845 }
0x1e28   :  { %v2208_v21 = vmul.f32 %v2846_v29, %v2844_v25  ;;  %v2848_v22 = vpop.eup %2847  ;;  %v2207_v52 = vmul.f32 %v2846_v29, %v2111_v3 }
0x1e29   :  { %v2201_v23 = vadd.f32 1.0, %v2848_v22 }
0x1e2a   :  { %2210 = vrot.lane.b32.xlu0 %v2208_v21, %s2955_s1 }
0x1e2b   :  { %2849 = vrcp.f32 %v2201_v23 }
0x1e35   :  { %v2850_v0 = vpop.eup %2849 }
0x1e9c   :  { %v2211_v63 = vpop.permute.xlu0 %2210 }
0x1e9d   :  { %v2213_v28 = vadd.f32 %v2211_v63, %v2207_v52 }
0x1e9f   :  { %2851 = vtanh.f32 %v2213_v28 }
0x1ea9   :  { %v2852_v33 = vpop.eup %2851 }
0x1eaa   :  { %v2215_v30 = vmul.f32 %v2852_v33, %v2850_v0 }
0x1eac   :  { %2217 = vrot.lane.b32.xlu1 %v2215_v30, %s2955_s1 }
0x1f1e   :  { %v2218_v31 = vpop.permute.xlu1 %2217 }
0x1f1f   :  { %v2221_v34 = vsel %vm348_vm0, %v2218_v31, %v3453_v50 }
0x1f20   :  { %v2229_v35 = vmul.f32 %v2312_v6, %v2221_v34 }
0x1f22   :  { %v2230_v8 = vsel %vm245_vm2, %v2229_v35, 0.0 }
0x1f23   :  { %2231 = vadd.xlane.f32.xlu0 %v2230_v8 }
0x1fb0   :  { %v2232_v11 = vpop.xlane.xlu0 %2231 }
0x1fb1   :  { %v2240_v37 = vadd.f32 %v2313_v36, %v2232_v11 }
0x1fb3   :  { %2242 = vst.msk [vmem:[%s3562_s11] sm:$0xff] %vm2241_vm3, %v2240_v37 }
0x1fb4   :  { %2247 = vsyncpa [#allocation5], 1 }
0x1fb5   :  { %2248 = vsyncpa [#allocation7], 1 }
0x1fb6   :  { %2249 = vsyncpa [#allocation10], 1 }

</bundles_post_ra>
